<compile_context>
chip_gen: v6e
topology: v6e:2x2x1
jax: 0.10.0
libtpu: 0.0.40
codegen_flags: <defaults>
</compile_context>

<pallas_src>
import functools

import jax
import jax.numpy as jnp
from jax import lax
from jax.experimental import pallas as pl
from jax.experimental.pallas import tpu as pltpu

SEQ = 8            # sequence length after squeeze(0)
IN = 128           # input_size  (lane-friendly)
OUT = 128          # output_size (lane-friendly)
EPS = 1e-8         # torch cosine-similarity eps
DEFAULT_TB = 1024  # pairs per grid step (4 MiB bf16 / 8 MiB f32 of input per step)
_SPLIT_MIN = 512   # keep >= 2 grid steps (v7x megacore) only if each still has >= this many pairs
_VMEM_LIMIT = 32 * 1024 * 1024  # legal on v5e/v6e (128 MiB phys) and v7x (64 MiB phys)


def _round_up(x, m):
    return ((x + m - 1) // m) * m


def phrase_pair_kernel(src_ref, tgt_ref, w_ref, b_ref, out_ref, *, seq, in_size):
    """One grid step processes TB phrase pairs.

    src_ref/tgt_ref: (TB, seq*in) bf16 or f32
    w_ref:           (OUT, IN) bf16, already scaled by 1/seq (mean folded in)
    b_ref:           (1, OUT) f32
    out_ref:         (TB, 1) f32 cosine similarities
    """
    def pool(ref):
        # Sum over seq chunks; each chunk is an aligned (TB, IN) lane slice.
        # 1/seq is folded into the weight, accumulation is f32.
        acc = ref[:, 0:in_size].astype(jnp.float32)
        for s in range(1, seq):
            acc = acc + ref[:, s * in_size:(s + 1) * in_size].astype(jnp.float32)
        return acc                                            # (TB, IN) f32

    w = w_ref[...].astype(jnp.float32)                        # (OUT, IN): bf16 -> f32 in VMEM
    b = b_ref[...]                                            # (1, OUT) f32

    def encode(pooled):
        # x @ W.T without transposing the PyTorch-layout weight.
        z = lax.dot_general(pooled, w, (((1,), (1,)), ((), ())),
                            preferred_element_type=jnp.float32)
        return jnp.tanh(z + b)                                # (TB, OUT) f32

    emb_src = encode(pool(src_ref))
    emb_tgt = encode(pool(tgt_ref))

    # Cosine similarity along the feature axis; one rsqrt instead of 2 sqrt + div.
    dot = jnp.sum(emb_src * emb_tgt, axis=-1, keepdims=True)  # (TB, 1)
    ss = jnp.sum(emb_src * emb_src, axis=-1, keepdims=True)
    tt = jnp.sum(emb_tgt * emb_tgt, axis=-1, keepdims=True)
    inv_denom = lax.rsqrt(jnp.maximum(ss * tt, EPS * EPS))
    out_ref[...] = dot * inv_denom                            # (TB, 1) f32


def prepare_params(weight_f32, bias_f32, seq):
    """One-time parameter prep (outside the hot path).

    Folds the 1/seq mean scale into the weight and stores it as bf16 in the
    original PyTorch (OUT, IN) layout (no transpose). Bias stays f32 (1, OUT).
    """
    w_scaled_bf16 = (weight_f32.astype(jnp.float32) / float(seq)).astype(jnp.bfloat16)
    b_2d = bias_f32.reshape(1, -1).astype(jnp.float32)
    return w_scaled_bf16, b_2d


def effective_weight(w_scaled_bf16, seq):
    """The f32 weight the kernel effectively applies (for references/tests)."""
    return w_scaled_bf16.astype(jnp.float32) * float(seq)


def _pick_tile(batch, tb):
    """Tile-size policy: big tiles for DMA efficiency, but >=2 grid steps for
    v7x megacore when the batch is large enough; multiples of 16 when tiling
    (bf16 sublane packing)."""
    if tb is None:
        tb = DEFAULT_TB
    if batch >= 2 * _SPLIT_MIN:
        tb = min(tb, _round_up(pl.cdiv(batch, 2), 8))
    if batch <= tb:
        return batch                       # single step; block == full batch extent
    return max(16, (tb // 16) * 16)


def phrase_embedding_forward_batched(src_b, tgt_b, w_scaled, b_2d, *, tb=None):
    """src_b / tgt_b: (B, SEQ, IN) phrase pairs (bf16 preferred, f32 accepted).

    Returns (B,) cosine similarities.
    """
    B, seq, in_size = src_b.shape
    out_size = w_scaled.shape[0]

    tb = _pick_tile(B, tb)
    grid = (pl.cdiv(B, tb),)               # ragged tail handled by Pallas boundary blocks

    # Free contiguous reshape: seq-pooling becomes aligned lane slices in-kernel.
    src2 = src_b.reshape(B, seq * in_size)
    tgt2 = tgt_b.reshape(B, seq * in_size)

    kernel = functools.partial(phrase_pair_kernel, seq=seq, in_size=in_size)

    out = pl.pallas_call(
        kernel,
        out_shape=jax.ShapeDtypeStruct((B, 1), jnp.float32),
        grid_spec=pltpu.PrefetchScalarGridSpec(
            num_scalar_prefetch=0,
            grid=grid,
            in_specs=[
                pl.BlockSpec((tb, seq * in_size), lambda i: (i, 0)),   # src tile
                pl.BlockSpec((tb, seq * in_size), lambda i: (i, 0)),   # tgt tile
                pl.BlockSpec((out_size, in_size), lambda i: (0, 0)),   # weight (resident)
                pl.BlockSpec((1, out_size), lambda i: (0, 0)),         # bias (resident)
            ],
            out_specs=pl.BlockSpec((tb, 1), lambda i: (i, 0)),
        ),
        compiler_params=pltpu.CompilerParams(
            dimension_semantics=("parallel",),   # shard batch steps across v7x TCs
            vmem_limit_bytes=_VMEM_LIMIT,
        ),
    )(src2, tgt2, w_scaled, b_2d)

    return out[:, 0]


def phrase_embedding_forward(input_source, input_target, w_scaled, b_2d):
    """Original single-pair module API: inputs are (1, SEQ, IN); returns a scalar."""
    src = jnp.squeeze(input_source, axis=0)[None]   # (1, SEQ, IN)
    tgt = jnp.squeeze(input_target, axis=0)[None]
    sims = phrase_embedding_forward_batched(src, tgt, w_scaled, b_2d)
    return sims[0]


def reference_forward_batched(src_b, tgt_b, weight, bias):
    """Pure-JAX reference (same math as the PyTorch module, f32)."""
    def encode(x):
        pooled = jnp.mean(x.astype(jnp.float32), axis=1)                    # (B, IN)
        z = jnp.einsum("bi,oi->bo", pooled, weight,
                       precision=lax.Precision.HIGHEST)
        return jnp.tanh(z + bias)                                           # (B, OUT)

    a = encode(src_b)
    b = encode(tgt_b)
    dot = jnp.sum(a * b, axis=-1)
    denom = jnp.maximum(jnp.linalg.norm(a, axis=-1) * jnp.linalg.norm(b, axis=-1), EPS)
    return dot / denom


if __name__ == "__main__":
    key = jax.random.PRNGKey(0)
    k_src, k_tgt, k_w, k_b = jax.random.split(key, 4)

    # Deliberately NOT a multiple of the tile -> exercises the ragged-tail path
    # (no jnp.pad of the activations anywhere).
    B = 300

    # Deterministic synthetic parameters (nn.Linear(input_size, output_size) shapes).
    bound = 1.0 / (IN ** 0.5)
    weight = jax.random.uniform(k_w, (OUT, IN), jnp.float32, -bound, bound)
    bias = jax.random.uniform(k_b, (OUT,), jnp.float32, -bound, bound)

    # Parameter prep once, outside the hot path (1/SEQ folded in, bf16, no transpose).
    w_scaled, b_2d = prepare_params(weight, bias, SEQ)
    weight_eff = effective_weight(w_scaled, SEQ)   # quantized weight the kernel applies

    # Activations arrive in bf16 (cast once upstream of the kernel -> half the HBM read).
    src_b = jax.random.normal(k_src, (B, SEQ, IN), jnp.float32).astype(jnp.bfloat16)
    tgt_b = jax.random.normal(k_tgt, (B, SEQ, IN), jnp.float32).astype(jnp.bfloat16)

    ref = reference_forward_batched(src_b, tgt_b, weight_eff, bias)

    # 1) Multi-step ragged grid (3 steps of 128 over 300 pairs).
    sims = jax.block_until_ready(
        phrase_embedding_forward_batched(src_b, tgt_b, w_scaled, b_2d, tb=128))
    assert sims.shape == (B,)
    assert jnp.allclose(sims, ref, atol=2e-4, rtol=2e-4), (
        float(jnp.max(jnp.abs(sims - ref))),)

    # 2) Default (auto) tile-size path.
    sims2 = jax.block_until_ready(
        phrase_embedding_forward_batched(src_b, tgt_b, w_scaled, b_2d))
    assert jnp.allclose(sims2, ref, atol=2e-4, rtol=2e-4), (
        float(jnp.max(jnp.abs(sims2 - ref))),)

    # 3) Original single-pair module API: (1, seq, input_size) per phrase -> scalar.
    sim0 = jax.block_until_ready(
        phrase_embedding_forward(src_b[0:1], tgt_b[0:1], w_scaled, b_2d))
    assert jnp.allclose(sim0, ref[0], atol=2e-4, rtol=2e-4), (float(sim0), float(ref[0]))

    print("KERNEL_OK")
</pallas_src>

<mosaic_0001>
module attributes {stable_mosaic.version = 11 : i64} {
  func.func @phrase_pair_kernel(%arg0: i32, %arg1: memref<128x1024xbf16, #tpu.memory_space<vmem>>, %arg2: memref<128x1024xbf16, #tpu.memory_space<vmem>>, %arg3: memref<128x128xbf16, #tpu.memory_space<vmem>>, %arg4: memref<1x128xf32, #tpu.memory_space<vmem>>, %arg5: memref<128x1xf32, #tpu.memory_space<vmem>>) attributes {dimension_semantics = [#tpu.dimension_semantics<parallel>], iteration_bounds = array<i64: 3>, scalar_prefetch = 0 : i64, scratch_operands = 0 : i64, tpu.core_type = #tpu.core_type<tc>, window_params = [{transform_indices = @transform_0, window_bounds = array<i64: 128, 1024>}, {transform_indices = @transform_1, window_bounds = array<i64: 128, 1024>}, {pipeline_mode = #tpu.pipeline_mode<synchronous>, transform_indices = @transform_2, window_bounds = array<i64: 128, 128>}, {pipeline_mode = #tpu.pipeline_mode<synchronous>, transform_indices = @transform_3, window_bounds = array<i64: 1, 128>}, {transform_indices = @transform_4, window_bounds = array<i64: 128, 1>}]} {
    %c0 = arith.constant 0 : index
    %c0_0 = arith.constant 0 : index
    %0 = vector.load %arg3[%c0, %c0_0] : memref<128x128xbf16, #tpu.memory_space<vmem>>, vector<128x128xbf16>
    %1 = arith.extf %0 : vector<128x128xbf16> to vector<128x128xf32>
    %c0_1 = arith.constant 0 : index
    %c0_2 = arith.constant 0 : index
    %2 = vector.load %arg4[%c0_1, %c0_2] : memref<1x128xf32, #tpu.memory_space<vmem>>, vector<1x128xf32>
    %c0_3 = arith.constant 0 : index
    %c0_4 = arith.constant 0 : index
    %3 = vector.load %arg1[%c0_3, %c0_4] : memref<128x1024xbf16, #tpu.memory_space<vmem>>, vector<128x128xbf16>
    %4 = arith.extf %3 : vector<128x128xbf16> to vector<128x128xf32>
    %c0_5 = arith.constant 0 : index
    %c128 = arith.constant 128 : index
    %5 = vector.load %arg1[%c0_5, %c128] : memref<128x1024xbf16, #tpu.memory_space<vmem>>, vector<128x128xbf16>
    %6 = arith.extf %5 : vector<128x128xbf16> to vector<128x128xf32>
    %7 = arith.addf %4, %6 : vector<128x128xf32>
    %c0_6 = arith.constant 0 : index
    %c256 = arith.constant 256 : index
    %8 = vector.load %arg1[%c0_6, %c256] : memref<128x1024xbf16, #tpu.memory_space<vmem>>, vector<128x128xbf16>
    %9 = arith.extf %8 : vector<128x128xbf16> to vector<128x128xf32>
    %10 = arith.addf %7, %9 : vector<128x128xf32>
    %c0_7 = arith.constant 0 : index
    %c384 = arith.constant 384 : index
    %11 = vector.load %arg1[%c0_7, %c384] : memref<128x1024xbf16, #tpu.memory_space<vmem>>, vector<128x128xbf16>
    %12 = arith.extf %11 : vector<128x128xbf16> to vector<128x128xf32>
    %13 = arith.addf %10, %12 : vector<128x128xf32>
    %c0_8 = arith.constant 0 : index
    %c512 = arith.constant 512 : index
    %14 = vector.load %arg1[%c0_8, %c512] : memref<128x1024xbf16, #tpu.memory_space<vmem>>, vector<128x128xbf16>
    %15 = arith.extf %14 : vector<128x128xbf16> to vector<128x128xf32>
    %16 = arith.addf %13, %15 : vector<128x128xf32>
    %c0_9 = arith.constant 0 : index
    %c640 = arith.constant 640 : index
    %17 = vector.load %arg1[%c0_9, %c640] : memref<128x1024xbf16, #tpu.memory_space<vmem>>, vector<128x128xbf16>
    %18 = arith.extf %17 : vector<128x128xbf16> to vector<128x128xf32>
    %19 = arith.addf %16, %18 : vector<128x128xf32>
    %c0_10 = arith.constant 0 : index
    %c768 = arith.constant 768 : index
    %20 = vector.load %arg1[%c0_10, %c768] : memref<128x1024xbf16, #tpu.memory_space<vmem>>, vector<128x128xbf16>
    %21 = arith.extf %20 : vector<128x128xbf16> to vector<128x128xf32>
    %22 = arith.addf %19, %21 : vector<128x128xf32>
    %c0_11 = arith.constant 0 : index
    %c896 = arith.constant 896 : index
    %23 = vector.load %arg1[%c0_11, %c896] : memref<128x1024xbf16, #tpu.memory_space<vmem>>, vector<128x128xbf16>
    %24 = arith.extf %23 : vector<128x128xbf16> to vector<128x128xf32>
    %25 = arith.addf %22, %24 : vector<128x128xf32>
    %cst = arith.constant dense<0.000000e+00> : vector<128x128xf32>
    %26 = tpu.matmul %25, %1, %cst {dimension_numbers = #tpu.dot_dimension_numbers<[1], [1], [0], [0], [0, 0, 1, 0], [], []>} : vector<128x128xf32>, vector<128x128xf32>, vector<128x128xf32> -> vector<128x128xf32>
    %27 = vector.broadcast %2 : vector<1x128xf32> to vector<128x128xf32>
    %28 = arith.addf %26, %27 : vector<128x128xf32>
    %29 = math.tanh %28 : vector<128x128xf32>
    %c0_12 = arith.constant 0 : index
    %c0_13 = arith.constant 0 : index
    %30 = vector.load %arg2[%c0_12, %c0_13] : memref<128x1024xbf16, #tpu.memory_space<vmem>>, vector<128x128xbf16>
    %31 = arith.extf %30 : vector<128x128xbf16> to vector<128x128xf32>
    %c0_14 = arith.constant 0 : index
    %c128_15 = arith.constant 128 : index
    %32 = vector.load %arg2[%c0_14, %c128_15] : memref<128x1024xbf16, #tpu.memory_space<vmem>>, vector<128x128xbf16>
    %33 = arith.extf %32 : vector<128x128xbf16> to vector<128x128xf32>
    %34 = arith.addf %31, %33 : vector<128x128xf32>
    %c0_16 = arith.constant 0 : index
    %c256_17 = arith.constant 256 : index
    %35 = vector.load %arg2[%c0_16, %c256_17] : memref<128x1024xbf16, #tpu.memory_space<vmem>>, vector<128x128xbf16>
    %36 = arith.extf %35 : vector<128x128xbf16> to vector<128x128xf32>
    %37 = arith.addf %34, %36 : vector<128x128xf32>
    %c0_18 = arith.constant 0 : index
    %c384_19 = arith.constant 384 : index
    %38 = vector.load %arg2[%c0_18, %c384_19] : memref<128x1024xbf16, #tpu.memory_space<vmem>>, vector<128x128xbf16>
    %39 = arith.extf %38 : vector<128x128xbf16> to vector<128x128xf32>
    %40 = arith.addf %37, %39 : vector<128x128xf32>
    %c0_20 = arith.constant 0 : index
    %c512_21 = arith.constant 512 : index
    %41 = vector.load %arg2[%c0_20, %c512_21] : memref<128x1024xbf16, #tpu.memory_space<vmem>>, vector<128x128xbf16>
    %42 = arith.extf %41 : vector<128x128xbf16> to vector<128x128xf32>
    %43 = arith.addf %40, %42 : vector<128x128xf32>
    %c0_22 = arith.constant 0 : index
    %c640_23 = arith.constant 640 : index
    %44 = vector.load %arg2[%c0_22, %c640_23] : memref<128x1024xbf16, #tpu.memory_space<vmem>>, vector<128x128xbf16>
    %45 = arith.extf %44 : vector<128x128xbf16> to vector<128x128xf32>
    %46 = arith.addf %43, %45 : vector<128x128xf32>
    %c0_24 = arith.constant 0 : index
    %c768_25 = arith.constant 768 : index
    %47 = vector.load %arg2[%c0_24, %c768_25] : memref<128x1024xbf16, #tpu.memory_space<vmem>>, vector<128x128xbf16>
    %48 = arith.extf %47 : vector<128x128xbf16> to vector<128x128xf32>
    %49 = arith.addf %46, %48 : vector<128x128xf32>
    %c0_26 = arith.constant 0 : index
    %c896_27 = arith.constant 896 : index
    %50 = vector.load %arg2[%c0_26, %c896_27] : memref<128x1024xbf16, #tpu.memory_space<vmem>>, vector<128x128xbf16>
    %51 = arith.extf %50 : vector<128x128xbf16> to vector<128x128xf32>
    %52 = arith.addf %49, %51 : vector<128x128xf32>
    %cst_28 = arith.constant dense<0.000000e+00> : vector<128x128xf32>
    %53 = tpu.matmul %52, %1, %cst_28 {dimension_numbers = #tpu.dot_dimension_numbers<[1], [1], [0], [0], [0, 0, 1, 0], [], []>} : vector<128x128xf32>, vector<128x128xf32>, vector<128x128xf32> -> vector<128x128xf32>
    %54 = vector.broadcast %2 : vector<1x128xf32> to vector<128x128xf32>
    %55 = arith.addf %53, %54 : vector<128x128xf32>
    %56 = math.tanh %55 : vector<128x128xf32>
    %57 = arith.mulf %29, %56 : vector<128x128xf32>
    %cst_29 = arith.constant dense<0.000000e+00> : vector<128xf32>
    %58 = vector.multi_reduction <add>, %57, %cst_29 [1] : vector<128x128xf32> to vector<128xf32>
    %59 = vector.shape_cast %58 : vector<128xf32> to vector<128x1xf32>
    %60 = arith.mulf %29, %29 : vector<128x128xf32>
    %cst_30 = arith.constant dense<0.000000e+00> : vector<128xf32>
    %61 = vector.multi_reduction <add>, %60, %cst_30 [1] : vector<128x128xf32> to vector<128xf32>
    %62 = vector.shape_cast %61 : vector<128xf32> to vector<128x1xf32>
    %63 = arith.mulf %56, %56 : vector<128x128xf32>
    %cst_31 = arith.constant dense<0.000000e+00> : vector<128xf32>
    %64 = vector.multi_reduction <add>, %63, %cst_31 [1] : vector<128x128xf32> to vector<128xf32>
    %65 = vector.shape_cast %64 : vector<128xf32> to vector<128x1xf32>
    %66 = arith.mulf %62, %65 : vector<128x1xf32>
    %cst_32 = arith.constant 1.000000e-16 : f32
    %67 = vector.broadcast %cst_32 : f32 to vector<128x1xf32>
    %68 = arith.maximumf %66, %67 : vector<128x1xf32>
    %69 = math.rsqrt %68 : vector<128x1xf32>
    %70 = arith.mulf %59, %69 : vector<128x1xf32>
    %c0_33 = arith.constant 0 : index
    %c0_34 = arith.constant 0 : index
    %71 = vector.load %arg5[%c0_33, %c0_34] : memref<128x1xf32, #tpu.memory_space<vmem>>, vector<128x1xf32>
    tpu.vector_store %arg5[%c0_33, %c0_34], %70 {strides = array<i32>} : memref<128x1xf32, #tpu.memory_space<vmem>>, vector<128x1xf32>,
    return
  }
  func.func @transform_0(%arg0: i32) -> (i32, i32) {
    %c0_i32 = arith.constant 0 : i32
    %c0_i32_0 = arith.constant 0 : i32
    return %arg0, %c0_i32 : i32, i32
  }
  func.func @transform_1(%arg0: i32) -> (i32, i32) {
    %c0_i32 = arith.constant 0 : i32
    %c0_i32_0 = arith.constant 0 : i32
    return %arg0, %c0_i32 : i32, i32
  }
  func.func @transform_2(%arg0: i32) -> (i32, i32) {
    %c0_i32 = arith.constant 0 : i32
    %c0_i32_0 = arith.constant 0 : i32
    %c0_i32_1 = arith.constant 0 : i32
    return %c0_i32, %c0_i32_0 : i32, i32
  }
  func.func @transform_3(%arg0: i32) -> (i32, i32) {
    %c0_i32 = arith.constant 0 : i32
    %c0_i32_0 = arith.constant 0 : i32
    %c0_i32_1 = arith.constant 0 : i32
    return %c0_i32, %c0_i32_0 : i32, i32
  }
  func.func @transform_4(%arg0: i32) -> (i32, i32) {
    %c0_i32 = arith.constant 0 : i32
    %c0_i32_0 = arith.constant 0 : i32
    return %arg0, %c0_i32 : i32, i32
  }
}

</mosaic_0001>

<bundles_post_ra>
// kernel: tpu_custom_call.1
= control target key start
LH: loop header
LB: loop body
LE: loop exit
PB: predicated region body
PF: predicated region fallthrough
CT: control target
= control target key end

     0   :  { %9 = vsyncpa [#allocation3], 0  ;;  %s3365_s0 = inlined_call_operand.hbm [shape: bf16[300,1024], index: 0, kind: input, shape index: {}]   ;;  %s3366_s1 = inlined_call_operand.hbm [shape: bf16[300,1024], index: 1, kind: input, shape index: {}]   ;;  %s3367_s2 = inlined_call_operand.hbm [shape: bf16[128,128], index: 2, kind: input, shape index: {}]   ;;  %s3368_s3 = inlined_call_operand.vmem [shape: f32[1,128], index: 3, kind: input, shape index: {}]   ;;  %s3369_s4 = inlined_call_operand.vmem [shape: f32[300,1], index: 4, kind: output, shape index: {}]  }
   0x1   :  { %11 = vsyncpa [#allocation3 + $0x1], 0 }
   0x2   :  { %12 = vsyncpa [#allocation5], 0 }
   0x3   :  { %14 = vsyncpa [#allocation5 + $0x1], 0  ;;  %s2640_s15 = smov 0   ;;  %s2642_s16 = smov 0  }
   0x4   :  { %s2644_s17 = smov 0   ;;  %s2646_s18 = smov 0  }
   0x5 LB: > { %s2659_s19 = sadd.s32 4294967295, %s2572_s18   ;;  %s2662_s20 = sadd.s32 1, %s2572_s18   ;;  %s2572_s18 = sphi %s2646_s18, %s3386_s18   ;;  %s2568_s17 = sphi %s2644_s17, %s3385_s17   ;;  %s2564_s16 = sphi %s2642_s16, %s3384_s16   ;;  %s2560_s15 = sphi %s2640_s15, %s3383_s15  }
   0x6   : > { %s24_s21 = ssub.s32 %s2572_s18, %s2662_s20  ;;  %s27_s22 = sadd.s32 1, %s2568_s17 }
   0x7   : > { %p25_p0 = scmp.eq.s32.totalorder %s24_s21, 0  ;;  %p34_p1 = scmp.ne.s32.totalorder %s2568_s17, %s2564_s16 }
   0x8   : > { %p35_p2 = scmp.eq.s32.totalorder %s2572_s18, 0  ;;  %p40_p3 = scmp.ne.s32.totalorder %s2564_s16, %s2560_s15 }
   0x9   : > { %s2672_s23 = scalar_select %p25_p0, %s2568_s17, %s27_s22  }
   0xa   : > { %p2674_p4 = por %p35_p2, %p34_p1  ;;  %p3371_p5 = scmp.eq.s32.totalorder %s2659_s19, 0 }
   0xb   : > { %p132_p6 = scmp.eq.s32.totalorder %s2659_s19, 2  ;;  %p1941_p7 = scmp.ge.s32.totalorder %s2572_s18, 1 }
   0xc   : > { %p2683_p8 = por %p3371_p5, %p40_p3  ;;  %p145_p9 = scmp.lt.s32.totalorder %s2572_s18, 4 }
   0xd   : > { %p2688_p10 = por %p132_p6, %p34_p1  ;;  %s2606_s28 = smov [#allocation6]  }
   0xe   : > { %s3373_s25 = scalar_select %p2683_p8, 1, 0 }
   0xf   : > { %s3374_s26 = scalar_select %p2688_p10, 1, 0 }
  0x10   : > { %p2692_p11 = pnand %p1941_p7, %p145_p9  ;;  %s157_s29 = sshll.u32 %s2606_s28, 4  ;;  %s158_s29 = int_to_ptr.vmem [resolvable:$true] %s157_s29 }
  0x11   : > { %s2431_s30 = scalar_lea.vmem %s158_s29, 1024  ;;  %p2439_p6 = scmp.lt.s32.totalorder %s158_s29, %s158_s29 }
  0x12   : > { %p2215_p12 = pneg %p2692_p11  ;;  %p2432_p2 = scmp.ne.s32.totalorder %s158_s29, %s2431_s30 }
  0x13   : > { %p2440_p8 = scmp.lt.s32.totalorder %s2431_s30, %s2431_s30 }
  0x14   : > { %p2216_p13 = pnand %p2215_p12, %p3371_p5 }
  0x15   : > { %p2441_p10 = por %p2440_p8, %p2439_p6 }
  0x16   : > { %p2422_p0 = pneg %p2216_p13 }
  0x18   : > { %p2434_p3 = pnand %p2432_p2, %p2422_p0 }
  0x1a   : > { %p2435_p1 = pneg %p2434_p3 }
  0x1c   : > { %p2442_p7 = pnand %p2441_p10, %p2435_p1 }
  0x1e   : > { %2445 = shalt.err (!%p2442_p7)
}
  0x1f   : > { %s2607_s5 = smov 64   ;;  %s2608_s6 = smov 4  }
  0x20   : > { %2218 = dma.hbm_to_vmem [thread:$0]  (!%p2216_p13), %s3367_s2, 1024, %s158_s29, [#allocation5], %s2607_s5, %s2607_s5, %s2608_s6  }
  0x21   : > { %p1943_p9 = scmp.ge.s32.totalorder %s2572_s18, 3 }
  0x23   : > { %170 = sbr.rel (%p1943_p9) target bundleno = 104 (0x68), region = 24 }
  0x28   : > { %173 = sbr.rel (!%p2674_p4) target bundleno = 72 (0x48), region = 28  ;;  %s174_s9 = sand.u32 (%p2674_p4), 1, %s2568_s17  }
  0x29   : > { %s1945_s10 = sshll.u32 (%p2674_p4), %s2572_s18, 4  ;;  %s1944_s11 = sshll.u32 (%p2674_p4), %s174_s9, 9 }
  0x2a   : > { %s180_s12 = ssub.s32 (%p2674_p4), 38, %s1945_s10  ;;  %s2711_s15 = scalar_lea.sflag (%p2674_p4), [#allocation3], %s174_s9 }
  0x2b   : > { %p181_p8 = scmp.lt.s32.totalorder (%p2674_p4), %s180_s12, 16  ;;  %s178_s21 = scalar_lea.vmem (%p2674_p4), [#allocation2], %s1944_s11 }
  0x2d   : > { %s3388_s12 = smov (!%p181_p8, %s180_s12), 16 }
  0x2e   : > { %s2708_s13 = sshll.u32 %s3388_s12, 9 }
  0x2f   : > { %s186_s14 = ssub.s32 8192, %s2708_s13 }
  0x30   : > { %187 = vsyncadd %s2711_s15, %s186_s14  ;;  %p1948_p10 = scmp.ne.s32.totalorder %s2708_s13, 0  ;;  %s1987_s22 = sshll.u32 %s2572_s18, 13 }
  0x31   : > { %s2719_s30 = scalar_lea.hbm %s3365_s0, %s1987_s22  ;;  %s193_s5 = sshll.u32 %s178_s21, 4  ;;  %s2721_s5 = int_to_ptr.vmem [resolvable:$true] %s193_s5 }
  0x32   : > { %s2446_s6 = scalar_lea.hbm %s2719_s30, %s2708_s13  ;;  %s2450_s9 = scalar_lea.hbm %s3365_s0, 19456 }
  0x33   : > { %p2447_p12 = scmp.ne.s32.totalorder %s2719_s30, %s2446_s6  ;;  %p2451_p2 = scmp.lt.s32.totalorder %s2719_s30, %s3365_s0 }
  0x34   : > { %p2452_p3 = scmp.lt.s32.totalorder %s2450_s9, %s2446_s6 }
  0x35   : > { %p2448_p13 = pnand %p2447_p12, %p1948_p10 }
  0x36   : > { %p2453_p1 = por %p2452_p3, %p2451_p2 }
  0x37   : > { %p2449_p0 = pneg %p2448_p13 }
  0x39   : > { %p2454_p6 = pnand %p2453_p1, %p2449_p0 }
  0x3b   : > { %2457 = shalt.err (!%p2454_p6)
}
  0x3c   : > { %s2458_s12 = scalar_lea.vmem %s2721_s5, %s2708_s13  ;;  %s2609_s14 = smov [#allocation2]  }
  0x3d   : > { %p2459_p7 = scmp.ne.s32.totalorder %s2721_s5, %s2458_s12  ;;  %s2462_s21 = sshll.u32 %s2609_s14, 4  ;;  %s2463_s21 = int_to_ptr.vmem [resolvable:$false] %s2462_s21 }
  0x3e   : > { %s2464_s22 = scalar_lea.vmem %s2463_s21, 16384  ;;  %p2465_p12 = scmp.lt.s32.totalorder %s2721_s5, %s2463_s21 }
  0x3f   : > { %p2460_p9 = pnand %p2459_p7, %p1948_p10  ;;  %p2466_p13 = scmp.lt.s32.totalorder %s2464_s22, %s2458_s12 }
  0x41   : > { %p2461_p8 = pneg %p2460_p9  ;;  %p2467_p5 = por %p2466_p13, %p2465_p12 }
  0x43   : > { %p2468_p2 = pnand %p2467_p5, %p2461_p8 }
  0x45   : > { %2471 = shalt.err (!%p2468_p2)
}
  0x46   : > { %s2610_s28 = smov 512   ;;  %s2611_s29 = smov 32  }
  0x47   : > { %199 = dma.hbm_to_vmem [thread:$0]  (%p1948_p10), %s2719_s30, %s2708_s13, %s2721_s5, %s2711_s15, %s2610_s28, %s2610_s28, %s2611_s29  }
  0x48 PF: > { %202 = sbr.rel (!%p2674_p4) target bundleno = 104 (0x68), region = 32  ;;  %s203_s6 = sand.u32 (%p2674_p4), 1, %s2572_s18  }
  0x49   : > { %s205_s7 = sand.u32 (%p2674_p4), 1, %s2568_s17   ;;  %s1954_s9 = sshll.u32 (%p2674_p4), %s2572_s18, 4 }
  0x4a   : > { %s1953_s8 = sshll.u32 (%p2674_p4), %s205_s7, 9  ;;  %s209_s10 = ssub.s32 (%p2674_p4), 38, %s1954_s9 }
  0x4b   : > { %p210_p5 = scmp.lt.s32.totalorder (%p2674_p4), %s209_s10, 16  ;;  %s2755_s14 = scalar_lea.sflag (%p2674_p4), [#allocation5], %s203_s6 }
  0x4c   : > { %s207_s13 = scalar_lea.vmem (%p2674_p4), [#allocation4], %s1953_s8 }
  0x4d   : > { %s3390_s10 = smov (!%p210_p5, %s209_s10), 16 }
  0x4e   : > { %s2752_s11 = sshll.u32 %s3390_s10, 9 }
  0x4f   : > { %s215_s12 = ssub.s32 8192, %s2752_s11 }
  0x50   : > { %216 = vsyncadd %s2755_s14, %s215_s12  ;;  %p1957_p4 = scmp.ne.s32.totalorder %s2752_s11, 0  ;;  %s1990_s24 = sshll.u32 %s2572_s18, 13 }
  0x51   : > { %s2763_s5 = scalar_lea.hbm %s3366_s1, %s1990_s24  ;;  %s222_s21 = sshll.u32 %s207_s13, 4  ;;  %s2765_s21 = int_to_ptr.vmem [resolvable:$true] %s222_s21 }
  0x52   : > { %s2472_s22 = scalar_lea.hbm %s2763_s5, %s2752_s11  ;;  %s2476_s18 = scalar_lea.hbm %s3366_s1, 19456 }
  0x53   : > { %p2473_p10 = scmp.ne.s32.totalorder %s2763_s5, %s2472_s22  ;;  %p2477_p1 = scmp.lt.s32.totalorder %s2763_s5, %s3366_s1 }
  0x54   : > { %p2478_p6 = scmp.lt.s32.totalorder %s2476_s18, %s2472_s22 }
  0x55   : > { %p2474_p0 = pnand %p2473_p10, %p1957_p4 }
  0x56   : > { %p2479_p7 = por %p2478_p6, %p2477_p1 }
  0x57   : > { %p2475_p3 = pneg %p2474_p0 }
  0x59   : > { %p2480_p9 = pnand %p2479_p7, %p2475_p3 }
  0x5b   : > { %2483 = shalt.err (!%p2480_p9)
}
  0x5c   : > { %s2484_s8 = scalar_lea.vmem %s2765_s21, %s2752_s11  ;;  %s2612_s9 = smov [#allocation4]  }
  0x5d   : > { %p2485_p8 = scmp.ne.s32.totalorder %s2765_s21, %s2484_s8  ;;  %s2488_s10 = sshll.u32 %s2612_s9, 4  ;;  %s2489_s10 = int_to_ptr.vmem [resolvable:$false] %s2488_s10 }
  0x5e   : > { %s2490_s12 = scalar_lea.vmem %s2489_s10, 16384  ;;  %p2491_p2 = scmp.lt.s32.totalorder %s2765_s21, %s2489_s10 }
  0x5f   : > { %p2486_p12 = pnand %p2485_p8, %p1957_p4  ;;  %p2492_p5 = scmp.lt.s32.totalorder %s2490_s12, %s2484_s8 }
  0x61   : > { %p2487_p13 = pneg %p2486_p12  ;;  %p2493_p10 = por %p2492_p5, %p2491_p2 }
  0x63   : > { %p2494_p0 = pnand %p2493_p10, %p2487_p13 }
  0x65   : > { %2497 = shalt.err (!%p2494_p0)
}
  0x66   : > { %s2613_s13 = smov 512   ;;  %s2614_s24 = smov 32  }
  0x67   : > { %228 = dma.hbm_to_vmem [thread:$0]  (%p1957_p4), %s2763_s5, %s2752_s11, %s2765_s21, %s2755_s14, %s2613_s13, %s2613_s13, %s2614_s24  }
  0x68 PF: > { %234 = sbr.rel (%p2692_p11) target bundleno = 670 (0x29e), region = 36  ;;  %s2794_s15 = sand.u32 (!%p2692_p11), 1, %s2564_s16  }
  0x69   : > { %s1963_s30 = sshll.u32 (!%p2692_p11), %s2794_s15, 9  ;;  %s237_s22 = scalar_lea.sflag (!%p2692_p11), [#allocation3], %s2794_s15 }
  0x6a   : > { %s2798_s28 = scalar_lea.vmem (!%p2692_p11), [#allocation2], %s1963_s30  ;;  %p3376_p3 = scmp.ne.s32.totalorder (!%p2692_p11), %s3373_s25, 0 }
  0x6d   : > { %2547 = dma.done.wait (%p3376_p3), %s237_s22, 8192  }
  0x6e   : > { %2549 = vsyncadd (%p3376_p3), %s237_s22, 4294959104  ;;  %s245_s11 = sand.u32 1, %s2659_s19   ;;  %s2805_s14 = scalar_lea.vmem [#allocation4], %s1963_s30 }
  0x6f   : > { %s246_s27 = scalar_lea.sflag [#allocation5], %s245_s11 }
  0x70   : > { %2551 = dma.done.wait (%p3376_p3), %s246_s27, 8192  }
  0x71   : > { %2553 = vsyncadd (%p3376_p3), %s246_s27, 4294959104  ;;  %p3377_p11 = scmp.eq.s32.totalorder %s2659_s19, 0 }
  0x73   : > { %2555 = dma.done.wait (%p3377_p11), [#allocation5], 1024   ;;  %p3378_p4 = pmov %p3377_p11 }
  0x74   : > { %v2032_v0 = vld [vmem:[#allocation6 + $0x38] sm:$0xff]   ;;  %v2031_v1 = vld [vmem:[#allocation6 + $0x30] sm:$0xff]   ;;  %v2030_v2 = vld [vmem:[#allocation6 + $0x28] sm:$0xff]   ;;  %s1966_s21 = sshll.u32 %s2794_s15, 7  ;;  %vm1604_vm0 = vcmask 7168   ;;  %p3379_p1 = scmp.ne.s32.totalorder %s3374_s26, 0 }
  0x75   : > { %2557 = vsyncadd (%p3378_p4), [#allocation5], 4294966272  ;;  %v2025_v3 = vunpack.c.h.bf16 %v2032_v0  ;;  %v2024_v4 = vunpack.c.l.bf16 %v2032_v0  ;;  %v2029_v5 = vld [vmem:[#allocation6 + $0x20] sm:$0xff]   ;;  %v2028_v6 = vld [vmem:[#allocation6 + $0x18] sm:$0xff]   ;;  %v2815_v8 = vunpack.c.h.bf16 %v2031_v1  ;;  %v2817_v9 = vunpack.c.l.bf16 %v2031_v1  ;;  %s3228_s29 = scalar_lea.vmem [#allocation7], %s1966_s21   ;;  %s1969_s18 = sshll.u32 (%p3379_p1), %s2659_s19, 4 }
  0x76   : > { %v2027_v7 = vld [vmem:[#allocation6 + $0x10] sm:$0xff]   ;;  %v2026_v10 = vld [vmem:[#allocation6 + $0x8] sm:$0xff]   ;;  %v332_v11 = vld [vmem:[%s2798_s28] sm:$0xff]   ;;  %v2820_v12 = vunpack.c.h.bf16 %v2030_v2  ;;  %v2822_v13 = vunpack.c.l.bf16 %v2030_v2  ;;  %v2824_v14 = vunpack.c.h.bf16 %v2029_v5  ;;  %v2826_v15 = vunpack.c.l.bf16 %v2029_v5  ;;  %s1991_s6 = sshll.u32 (%p3379_p1), %s2659_s19, 7  ;;  %s1629_s7 = ssub.s32 (%p3379_p1), 38, %s1969_s18 }
  0x77   : > { %2097 = vmatprep.subr.mxu0 %v2025_v3  ;;  %2153 = vmatprep.subr.mxu1 %v2025_v3  ;;  %v1995_v16 = vld [vmem:[#allocation6] sm:$0xff]   ;;  %v412_v17 = vld [vmem:[%s2798_s28 + $0x8] sm:$0xff]   ;;  %v2829_v18 = vunpack.c.h.bf16 %v2028_v6  ;;  %v2831_v19 = vunpack.c.l.bf16 %v2028_v6  ;;  %v2833_v20 = vunpack.c.h.bf16 %v2027_v7  ;;  %v2835_v21 = vunpack.c.l.bf16 %v2027_v7  ;;  %v508_v28 = vld [vmem:[%s2798_s28 + $0x10] sm:$0xff]   ;;  %s3269_s10 = scalar_lea.vmem (%p3379_p1), %s3369_s4, %s1991_s6   ;;  %p1630_p6 = scmp.lt.s32.totalorder (%p3379_p1), %s1629_s7, 16 }
  0x78   : > { %2098 = vmatpush3.xpose.msra.mxu0 %v2025_v3  ;;  %2154 = vmatpush3.xpose.msra.mxu1 %v2025_v3  ;;  %v867_v22 = vld [vmem:[%s2805_s14] sm:$0xff]   ;;  %v947_v23 = vld [vmem:[%s2805_s14 + $0x8] sm:$0xff]   ;;  %v2839_v24 = vunpack.c.h.bf16 %v2026_v10  ;;  %v348_v25 = vunpack.c.l.bf16 %v332_v11  ;;  %v380_v26 = vunpack.c.h.bf16 %v332_v11  ;;  %v428_v27 = vunpack.c.l.bf16 %v412_v17  ;;  %v2843_v29 = vld [vmem:[%s2798_s28 + $0x18] sm:$0xff]  }
  0x79   : > { %2099 = vmatprep.subr.mxu0 %v2024_v4  ;;  %2155 = vmatprep.subr.mxu1 %v2024_v4  ;;  %v2845_v30 = vunpack.c.l.bf16 %v2026_v10  ;;  %v2847_v31 = vunpack.c.h.bf16 %v1995_v16  ;;  %v2849_v32 = vunpack.c.l.bf16 %v1995_v16  ;;  %v476_v33 = vunpack.c.h.bf16 %v412_v17  ;;  %v333_v34 = vld [vmem:[%s2798_s28 + $0x20] sm:$0xff]   ;;  %v1043_v39 = vld [vmem:[%s2805_s14 + $0x10] sm:$0xff]   ;;  %v413_v40 = vld [vmem:[%s2798_s28 + $0x28] sm:$0xff]  }
  0x7a   : > { %v396_v35 = vadd.f32 %v380_v26, %v348_v25  ;;  %v883_v36 = vunpack.c.l.bf16 %v867_v22  ;;  %v915_v37 = vunpack.c.h.bf16 %v867_v22  ;;  %v963_v38 = vunpack.c.l.bf16 %v947_v23  ;;  %v2857_v45 = vld [vmem:[%s2805_s14 + $0x18] sm:$0xff]   ;;  %v868_v50 = vld [vmem:[%s2805_s14 + $0x20] sm:$0xff]   ;;  %v509_v55 = vld [vmem:[%s2798_s28 + $0x30] sm:$0xff]  }
  0x7b   : > { %v524_v41 = vunpack.c.l.bf16 %v508_v28  ;;  %v572_v42 = vunpack.c.h.bf16 %v508_v28  ;;  %v620_v43 = vunpack.c.l.bf16 %v2843_v29  ;;  %v668_v44 = vunpack.c.h.bf16 %v2843_v29  ;;  %v948_v56 = vld [vmem:[%s2805_s14 + $0x28] sm:$0xff]   ;;  %v2869_v63 = vld [vmem:[%s2798_s28 + $0x38] sm:$0xff]   ;;  %v1044_v2 = vld [vmem:[%s2805_s14 + $0x30] sm:$0xff]  }
  0x7c   : > { %2100 = vmatpush3.xpose.msra.mxu0 %v2024_v4  ;;  %2156 = vmatpush3.xpose.msra.mxu1 %v2024_v4  ;;  %v444_v46 = vadd.f32 %v428_v27, %v396_v35  ;;  %v931_v47 = vadd.f32 %v915_v37, %v883_v36  ;;  %v1011_v48 = vunpack.c.h.bf16 %v947_v23  ;;  %v349_v49 = vunpack.c.l.bf16 %v333_v34  ;;  %v334_v7 = vld [vmem:[%s2798_s28 + $0x40] sm:$0xff]   ;;  %v414_v17 = vld [vmem:[%s2798_s28 + $0x48] sm:$0xff]  }
  0x7d   : > { %2101 = vmatprep.subr.mxu0 %v2815_v8  ;;  %2157 = vmatprep.subr.mxu1 %v2815_v8  ;;  %v1059_v51 = vunpack.c.l.bf16 %v1043_v39  ;;  %v1107_v52 = vunpack.c.h.bf16 %v1043_v39  ;;  %v381_v53 = vunpack.c.h.bf16 %v333_v34  ;;  %v429_v54 = vunpack.c.l.bf16 %v413_v40 }
  0x7e   : > { %v492_v57 = vadd.f32 %v476_v33, %v444_v46  ;;  %v979_v58 = vadd.f32 %v963_v38, %v931_v47  ;;  %v1155_v59 = vunpack.c.l.bf16 %v2857_v45  ;;  %v1203_v60 = vunpack.c.h.bf16 %v2857_v45  ;;  %v2880_v33 = vld [vmem:[%s2805_s14 + $0x38] sm:$0xff]   ;;  %v869_v46 = vld [vmem:[%s2805_s14 + $0x40] sm:$0xff]   ;;  %v949_v47 = vld [vmem:[%s2805_s14 + $0x48] sm:$0xff]  }
  0x7f   : > { %v397_v61 = vadd.f32 %v381_v53, %v349_v49  ;;  %v477_v62 = vunpack.c.h.bf16 %v413_v40  ;;  %v884_v0 = vunpack.c.l.bf16 %v868_v50  ;;  %v916_v1 = vunpack.c.h.bf16 %v868_v50  ;;  %v510_v40 = vld [vmem:[%s2798_s28 + $0x50] sm:$0xff]  }
  0x80   : > { %2102 = vmatpush3.xpose.msra.mxu0 %v2815_v8  ;;  %2158 = vmatpush3.xpose.msra.mxu1 %v2815_v8  ;;  %v540_v3 = vadd.f32 %v524_v41, %v492_v57  ;;  %v1027_v4 = vadd.f32 %v1011_v48, %v979_v58  ;;  %v525_v5 = vunpack.c.l.bf16 %v509_v55  ;;  %v964_v6 = vunpack.c.l.bf16 %v948_v56  ;;  %v1045_v58 = vld [vmem:[%s2805_s14 + $0x50] sm:$0xff]  }
  0x81   : > { %2103 = vmatprep.subr.mxu0 %v2817_v9  ;;  %2159 = vmatprep.subr.mxu1 %v2817_v9  ;;  %v445_v10 = vadd.f32 %v429_v54, %v397_v61  ;;  %v573_v8 = vunpack.c.h.bf16 %v509_v55  ;;  %v932_v11 = vadd.f32 %v916_v1, %v884_v0  ;;  %v1012_v16 = vunpack.c.h.bf16 %v948_v56  ;;  %v2894_v55 = vld [vmem:[%s2798_s28 + $0x58] sm:$0xff]   ;;  %v415_v0 = vld [vmem:[%s2798_s28 + $0x68] sm:$0xff]  }
  0x82   : > { %v588_v22 = vadd.f32 %v572_v42, %v540_v3  ;;  %v1075_v23 = vadd.f32 %v1059_v51, %v1027_v4  ;;  %v621_v25 = vunpack.c.l.bf16 %v2869_v63  ;;  %v1060_v26 = vunpack.c.l.bf16 %v1044_v2  ;;  %v2904_v4 = vld [vmem:[%s2805_s14 + $0x58] sm:$0xff]  }
  0x83   : > { %v493_v27 = vadd.f32 %v477_v62, %v445_v10  ;;  %v980_v28 = vadd.f32 %v964_v6, %v932_v11  ;;  %v350_v34 = vunpack.c.l.bf16 %v334_v7  ;;  %v382_v35 = vunpack.c.h.bf16 %v334_v7 }
  0x84   : > { %2104 = vmatpush3.xpose.msra.mxu0 %v2817_v9  ;;  %2160 = vmatpush3.xpose.msra.mxu1 %v2817_v9  ;;  %v636_v36 = vadd.f32 %v620_v43, %v588_v22  ;;  %v1123_v37 = vadd.f32 %v1107_v52, %v1075_v23  ;;  %v1108_v38 = vunpack.c.h.bf16 %v1044_v2  ;;  %v430_v39 = vunpack.c.l.bf16 %v414_v17  ;;  %v511_v22 = vld [vmem:[%s2798_s28 + $0x70] sm:$0xff]   ;;  %v870_v23 = vld [vmem:[%s2805_s14 + $0x60] sm:$0xff]  }
  0x85   : > { %2105 = vmatprep.subr.mxu0 %v2820_v12  ;;  %2161 = vmatprep.subr.mxu1 %v2820_v12  ;;  %v541_v41 = vadd.f32 %v525_v5, %v493_v27  ;;  %v1028_v9 = vadd.f32 %v1012_v16, %v980_v28  ;;  %v398_v42 = vadd.f32 %v382_v35, %v350_v34  ;;  %v478_v45 = vunpack.c.h.bf16 %v414_v17  ;;  %v950_v28 = vld [vmem:[%s2805_s14 + $0x68] sm:$0xff]  }
  0x86   : > { %v684_v48 = vadd.f32 %v668_v44, %v636_v36  ;;  %v1171_v49 = vadd.f32 %v1155_v59, %v1123_v37  ;;  %v669_v50 = vunpack.c.h.bf16 %v2869_v63  ;;  %v1156_v43 = vunpack.c.l.bf16 %v2880_v33  ;;  %v335_v63 = vld [vmem:[%s2798_s28 + $0x60] sm:$0xff]   ;;  %v2919_v37 = vld [vmem:[%s2798_s28 + $0x78] sm:$0xff]  }
  0x87   : > { %v589_v51 = vadd.f32 %v573_v8, %v541_v41  ;;  %v1076_v52 = vadd.f32 %v1060_v26, %v1028_v9  ;;  %v446_v53 = vadd.f32 %v430_v39, %v398_v42  ;;  %v526_v54 = vunpack.c.l.bf16 %v510_v40  ;;  %v1046_v9 = vld [vmem:[%s2805_s14 + $0x70] sm:$0xff]  }
  0x88   : > { %2106 = vmatpush3.xpose.msra.mxu0 %v2820_v12  ;;  %2162 = vmatpush3.xpose.msra.mxu1 %v2820_v12  ;;  %v1219_v29 = vadd.f32 %v1203_v60, %v1171_v49  ;;  %v885_v44 = vunpack.c.l.bf16 %v869_v46  ;;  %v917_v56 = vunpack.c.h.bf16 %v869_v46  ;;  %v965_v57 = vunpack.c.l.bf16 %v949_v47  ;;  %v416_v49 = vld [vmem:[%s2798_s28 + $0x88] sm:$0xff]  }
  0x89   : > { %2107 = vmatprep.subr.mxu0 %v2822_v13  ;;  %2163 = vmatprep.subr.mxu1 %v2822_v13  ;;  %v637_v12 = vadd.f32 %v621_v25, %v589_v51  ;;  %v1124_v59 = vadd.f32 %v1108_v38, %v1076_v52  ;;  %v494_v61 = vadd.f32 %v478_v45, %v446_v53  ;;  %v574_v62 = vunpack.c.h.bf16 %v510_v40 }
  0x8a   : > { %2129 = vmatprep.mubr.f32.mxu0 %v684_v48  ;;  %2185 = vmatprep.mubr.f32.mxu1 %v1219_v29  ;;  %v1204_v1 = vunpack.c.h.bf16 %v2880_v33  ;;  %v622_v2 = vunpack.c.l.bf16 %v2894_v55  ;;  %v933_v3 = vadd.f32 %v917_v56, %v885_v44  ;;  %v1013_v60 = vunpack.c.h.bf16 %v949_v47  ;;  %v336_v48 = vld [vmem:[%s2798_s28 + $0x80] sm:$0xff]   ;;  %v2933_v29 = vld [vmem:[%s2805_s14 + $0x78] sm:$0xff]  }
  0x8b   : > { %v1172_v5 = vadd.f32 %v1156_v43, %v1124_v59  ;;  %v542_v6 = vadd.f32 %v526_v54, %v494_v61  ;;  %v670_v7 = vunpack.c.h.bf16 %v2894_v55  ;;  %v1061_v10 = vunpack.c.l.bf16 %v1045_v58  ;;  %v871_v59 = vld [vmem:[%s2805_s14 + $0x80] sm:$0xff]  }
  0x8c   : > { %2108 = vmatpush3.xpose.msra.mxu0 %v2822_v13  ;;  %2164 = vmatpush3.xpose.msra.mxu1 %v2822_v13  ;;  %v981_v8 = vadd.f32 %v965_v57, %v933_v3  ;;  %v351_v11 = vunpack.c.l.bf16 %v335_v63  ;;  %v383_v16 = vunpack.c.h.bf16 %v335_v63  ;;  %v431_v17 = vunpack.c.l.bf16 %v415_v0 }
  0x8d   : > { %2109 = vmatprep.subr.mxu0 %v2824_v14  ;;  %2165 = vmatprep.subr.mxu1 %v2824_v14  ;;  %v2913_v25 = vadd.f32 %v669_v50, %v637_v12  ;;  %v590_v13 = vadd.f32 %v574_v62, %v542_v6  ;;  %v1109_v26 = vunpack.c.h.bf16 %v1045_v58  ;;  %v1157_v27 = vunpack.c.l.bf16 %v2904_v4  ;;  %v512_v12 = vld [vmem:[%s2798_s28 + $0x90] sm:$0xff]  }
  0x8e   : > { %v1029_v33 = vadd.f32 %v1013_v60, %v981_v8  ;;  %v1205_v34 = vunpack.c.h.bf16 %v2904_v4  ;;  %v399_v35 = vadd.f32 %v383_v16, %v351_v11  ;;  %v479_v36 = vunpack.c.h.bf16 %v415_v0  ;;  %v2946_v4 = vld [vmem:[%s2798_s28 + $0x98] sm:$0xff]  }
  0x8f   : > { %v2923_v38 = vadd.f32 %v1204_v1, %v1172_v5  ;;  %v527_v39 = vunpack.c.l.bf16 %v511_v22  ;;  %v886_v40 = vunpack.c.l.bf16 %v870_v23  ;;  %v918_v41 = vunpack.c.h.bf16 %v870_v23  ;;  %v951_v1 = vld [vmem:[%s2805_s14 + $0x88] sm:$0xff]   ;;  %v337_v23 = vld [vmem:[%s2798_s28 + $0xa0] sm:$0xff]  }
  0x90   : > { %2110 = vmatpush3.xpose.msra.mxu0 %v2824_v14  ;;  %2166 = vmatpush3.xpose.msra.mxu1 %v2824_v14  ;;  %v638_v42 = vadd.f32 %v622_v2, %v590_v13  ;;  %v1077_v45 = vadd.f32 %v1061_v10, %v1029_v33  ;;  %v447_v46 = vadd.f32 %v431_v17, %v399_v35  ;;  %v966_v47 = vunpack.c.l.bf16 %v950_v28  ;;  %v417_v33 = vld [vmem:[%s2798_s28 + $0xa8] sm:$0xff]  }
  0x91   : > { %2111 = vmatprep.subr.mxu0 %v2826_v15  ;;  %2167 = vmatprep.subr.mxu1 %v2826_v15  ;;  %v575_v50 = vunpack.c.h.bf16 %v511_v22  ;;  %v623_v14 = vunpack.c.l.bf16 %v2919_v37  ;;  %v934_v43 = vadd.f32 %v918_v41, %v886_v40  ;;  %v1014_v51 = vunpack.c.h.bf16 %v950_v28  ;;  %v1047_v22 = vld [vmem:[%s2805_s14 + $0x90] sm:$0xff]   ;;  %v2960_v40 = vld [vmem:[%s2805_s14 + $0x98] sm:$0xff]  }
  0x92   : > { %v1125_v52 = vadd.f32 %v1109_v26, %v1077_v45  ;;  %v495_v53 = vadd.f32 %v479_v36, %v447_v46  ;;  %v671_v54 = vunpack.c.h.bf16 %v2919_v37  ;;  %v1062_v55 = vunpack.c.l.bf16 %v1046_v9 }
  0x93   : > { %v982_v44 = vadd.f32 %v966_v47, %v934_v43  ;;  %v352_v56 = vunpack.c.l.bf16 %v336_v48  ;;  %v384_v57 = vunpack.c.h.bf16 %v336_v48  ;;  %v432_v58 = vunpack.c.l.bf16 %v416_v49 }
  0x94   : > { %2112 = vmatpush3.xpose.msra.mxu0 %v2826_v15  ;;  %2168 = vmatpush3.xpose.msra.mxu1 %v2826_v15  ;;  %v2941_v61 = vadd.f32 %v670_v7, %v638_v42  ;;  %v1173_v62 = vadd.f32 %v1157_v27, %v1125_v52  ;;  %v543_v63 = vadd.f32 %v527_v39, %v495_v53  ;;  %v1110_v0 = vunpack.c.h.bf16 %v1046_v9  ;;  %v952_v53 = vld [vmem:[%s2805_s14 + $0xa8] sm:$0xff]  }
  0x95   : > { %2113 = vmatprep.subr.mxu0 %v2829_v18  ;;  %2169 = vmatprep.subr.mxu1 %v2829_v18  ;;  %v1030_v2 = vadd.f32 %v1014_v51, %v982_v44  ;;  %v1158_v15 = vunpack.c.l.bf16 %v2933_v29  ;;  %v400_v3 = vadd.f32 %v384_v57, %v352_v56  ;;  %v480_v60 = vunpack.c.h.bf16 %v416_v49  ;;  %v513_v49 = vld [vmem:[%s2798_s28 + $0xb0] sm:$0xff]  }
  0x96   : > { %v591_v5 = vadd.f32 %v575_v50, %v543_v63  ;;  %v1206_v6 = vunpack.c.h.bf16 %v2933_v29  ;;  %v528_v10 = vunpack.c.l.bf16 %v512_v12  ;;  %v887_v7 = vunpack.c.l.bf16 %v871_v59  ;;  %v872_v50 = vld [vmem:[%s2805_s14 + $0xa0] sm:$0xff]  }
  0x97   : > { %v1078_v8 = vadd.f32 %v1062_v55, %v1030_v2  ;;  %v448_v11 = vadd.f32 %v432_v58, %v400_v3  ;;  %v919_v16 = vunpack.c.h.bf16 %v871_v59  ;;  %v967_v17 = vunpack.c.l.bf16 %v951_v1  ;;  %v2977_v58 = vld [vmem:[%s2798_s28 + $0xb8] sm:$0xff]  }
  0x98   : > { %2114 = vmatpush3.xpose.msra.mxu0 %v2829_v18  ;;  %2170 = vmatpush3.xpose.msra.mxu1 %v2829_v18  ;;  %v2955_v13 = vadd.f32 %v1205_v34, %v1173_v62  ;;  %v639_v26 = vadd.f32 %v623_v14, %v591_v5  ;;  %v576_v27 = vunpack.c.h.bf16 %v512_v12  ;;  %v624_v28 = vunpack.c.l.bf16 %v2946_v4  ;;  %v1048_v62 = vld [vmem:[%s2805_s14 + $0xb0] sm:$0xff]  }
  0x99   : > { %2115 = vmatprep.subr.mxu0 %v2831_v19  ;;  %2171 = vmatprep.subr.mxu1 %v2831_v19  ;;  %v1126_v18 = vadd.f32 %v1110_v0, %v1078_v8  ;;  %v496_v35 = vadd.f32 %v480_v60, %v448_v11  ;;  %v935_v36 = vadd.f32 %v919_v16, %v887_v7  ;;  %v1015_v39 = vunpack.c.h.bf16 %v951_v1  ;;  %v338_v1 = vld [vmem:[%s2798_s28 + $0xc0] sm:$0xff]   ;;  %v2991_v16 = vld [vmem:[%s2805_s14 + $0xb8] sm:$0xff]  }
  0x9a   : > { %v672_v41 = vunpack.c.h.bf16 %v2946_v4  ;;  %v1063_v9 = vunpack.c.l.bf16 %v1047_v22  ;;  %v353_v42 = vunpack.c.l.bf16 %v337_v23  ;;  %v385_v34 = vunpack.c.h.bf16 %v337_v23  ;;  %v418_v4 = vld [vmem:[%s2798_s28 + $0xc8] sm:$0xff]   ;;  %v873_v23 = vld [vmem:[%s2805_s14 + $0xc0] sm:$0xff]  }
  0x9b   : > { %v544_v45 = vadd.f32 %v528_v10, %v496_v35  ;;  %v983_v46 = vadd.f32 %v967_v17, %v935_v36  ;;  %v1111_v47 = vunpack.c.h.bf16 %v1047_v22  ;;  %v433_v48 = vunpack.c.l.bf16 %v417_v33 }
  0x9c   : > { %2116 = vmatpush3.xpose.msra.mxu0 %v2831_v19  ;;  %2172 = vmatpush3.xpose.msra.mxu1 %v2831_v19  ;;  %v1174_v14 = vadd.f32 %v1158_v15, %v1126_v18  ;;  %v1159_v43 = vunpack.c.l.bf16 %v2960_v40  ;;  %v401_v51 = vadd.f32 %v385_v34, %v353_v42  ;;  %v481_v52 = vunpack.c.h.bf16 %v417_v33 }
  0x9d   : > { %2117 = vmatprep.subr.mxu0 %v2833_v20  ;;  %2173 = vmatprep.subr.mxu1 %v2833_v20  ;;  %v2973_v19 = vadd.f32 %v671_v54, %v639_v26  ;;  %v592_v55 = vadd.f32 %v576_v27, %v544_v45  ;;  %v1031_v29 = vadd.f32 %v1015_v39, %v983_v46  ;;  %v1207_v44 = vunpack.c.h.bf16 %v2960_v40  ;;  %v3002_v40 = vld [vmem:[%s2798_s28 + $0xd8] sm:$0xff]  }
  0x9e   : > { %v449_v56 = vadd.f32 %v433_v48, %v401_v51  ;;  %v529_v57 = vunpack.c.l.bf16 %v513_v49  ;;  %v888_v12 = vunpack.c.l.bf16 %v872_v50  ;;  %v920_v59 = vunpack.c.h.bf16 %v872_v50  ;;  %v339_v50 = vld [vmem:[%s2798_s28 + $0xe0] sm:$0xff]  }
  0x9f   : > { %v640_v37 = vadd.f32 %v624_v28, %v592_v55  ;;  %v1079_v54 = vadd.f32 %v1063_v9, %v1031_v29  ;;  %v577_v63 = vunpack.c.h.bf16 %v513_v49  ;;  %v968_v0 = vunpack.c.l.bf16 %v952_v53  ;;  %v953_v9 = vld [vmem:[%s2805_s14 + $0xc8] sm:$0xff]   ;;  %v3008_v49 = vld [vmem:[%s2805_s14 + $0xd0] sm:$0xff]  }
  0xa0   : > { %2118 = vmatpush3.xpose.msra.mxu0 %v2833_v20  ;;  %2174 = vmatpush3.xpose.msra.mxu1 %v2833_v20  ;;  %v2985_v2 = vadd.f32 %v1206_v6, %v1174_v14  ;;  %v497_v15 = vadd.f32 %v481_v52, %v449_v56  ;;  %v936_v3 = vadd.f32 %v920_v59, %v888_v12  ;;  %v1016_v60 = vunpack.c.h.bf16 %v952_v53  ;;  %v514_v6 = vld [vmem:[%s2798_s28 + $0xd0] sm:$0xff]   ;;  %v419_v53 = vld [vmem:[%s2798_s28 + $0xe8] sm:$0xff]  }
  0xa1   : > { %2119 = vmatprep.subr.mxu0 %v2835_v21  ;;  %2175 = vmatprep.subr.mxu1 %v2835_v21  ;;  %v1127_v5 = vadd.f32 %v1111_v47, %v1079_v54  ;;  %v625_v20 = vunpack.c.l.bf16 %v2977_v58  ;;  %v673_v10 = vunpack.c.h.bf16 %v2977_v58  ;;  %v1064_v7 = vunpack.c.l.bf16 %v1048_v62 }
  0xa2   : > { %v545_v8 = vadd.f32 %v529_v57, %v497_v15  ;;  %v984_v11 = vadd.f32 %v968_v0, %v936_v3  ;;  %v354_v17 = vunpack.c.l.bf16 %v338_v1  ;;  %v386_v22 = vunpack.c.h.bf16 %v338_v1  ;;  %v874_v1 = vld [vmem:[%s2805_s14 + $0xe0] sm:$0xff]  }
  0xa3   : > { %v2997_v26 = vadd.f32 %v672_v41, %v640_v37  ;;  %v1175_v27 = vadd.f32 %v1159_v43, %v1127_v5  ;;  %v1112_v28 = vunpack.c.h.bf16 %v1048_v62  ;;  %v434_v33 = vunpack.c.l.bf16 %v418_v4  ;;  %v515_v62 = vld [vmem:[%s2798_s28 + $0xf0] sm:$0xff]   ;;  %v954_v5 = vld [vmem:[%s2805_s14 + $0xe8] sm:$0xff]  }
  0xa4   : > { %2120 = vmatpush3.xpose.msra.mxu0 %v2835_v21  ;;  %2176 = vmatpush3.xpose.msra.mxu1 %v2835_v21  ;;  %v593_v18 = vadd.f32 %v577_v63, %v545_v8  ;;  %v1032_v35 = vadd.f32 %v1016_v60, %v984_v11  ;;  %v402_v36 = vadd.f32 %v386_v22, %v354_v17  ;;  %v482_v39 = vunpack.c.h.bf16 %v418_v4 }
  0xa5   : > { %2121 = vmatprep.subr.mxu0 %v2839_v24  ;;  %2177 = vmatprep.subr.mxu1 %v2839_v24  ;;  %v1160_v21 = vunpack.c.l.bf16 %v2991_v16  ;;  %v1208_v41 = vunpack.c.h.bf16 %v2991_v16  ;;  %v530_v42 = vunpack.c.l.bf16 %v514_v6  ;;  %v889_v34 = vunpack.c.l.bf16 %v873_v23 }
  0xa6   : > { %v1080_v45 = vadd.f32 %v1064_v7, %v1032_v35  ;;  %v450_v46 = vadd.f32 %v434_v33, %v402_v36  ;;  %v578_v47 = vunpack.c.h.bf16 %v514_v6  ;;  %v921_v48 = vunpack.c.h.bf16 %v873_v23  ;;  %v1050_v6 = vld [vmem:[%s2805_s14 + $0xf0] sm:$0xff]   ;;  %v340_v23 = vld [vmem:[%s2798_s28 + $0x100] sm:$0xff]  }
  0xa7   : > { %v3013_v14 = vadd.f32 %v1207_v44, %v1175_v27  ;;  %v641_v43 = vadd.f32 %v625_v20, %v593_v18  ;;  %v626_v51 = vunpack.c.l.bf16 %v3002_v40  ;;  %v969_v52 = vunpack.c.l.bf16 %v953_v9  ;;  %v3022_v44 = vld [vmem:[%s2805_s14 + $0xd8] sm:$0xff]  }
  0xa8   : > { %2122 = vmatpush3.xpose.msra.mxu0 %v2839_v24  ;;  %2178 = vmatpush3.xpose.msra.mxu1 %v2839_v24  ;;  %v1128_v55 = vadd.f32 %v1112_v28, %v1080_v45  ;;  %v498_v29 = vadd.f32 %v482_v39, %v450_v46  ;;  %v674_v56 = vunpack.c.h.bf16 %v3002_v40  ;;  %v1017_v57 = vunpack.c.h.bf16 %v953_v9  ;;  %v3046_v9 = vld [vmem:[%s2805_s14 + $0xf8] sm:$0xff]  }
  0xa9   : > { %2123 = vmatprep.subr.mxu0 %v2845_v30  ;;  %2179 = vmatprep.subr.mxu1 %v2845_v30  ;;  %v937_v58 = vadd.f32 %v921_v48, %v889_v34  ;;  %v1065_v24 = vunpack.c.l.bf16 %v3008_v49  ;;  %v355_v12 = vunpack.c.l.bf16 %v339_v50  ;;  %v387_v59 = vunpack.c.h.bf16 %v339_v50 }
  0xaa   : > { %v1176_v37 = vadd.f32 %v1160_v21, %v1128_v55  ;;  %v546_v54 = vadd.f32 %v530_v42, %v498_v29  ;;  %v1113_v63 = vunpack.c.h.bf16 %v3008_v49  ;;  %v435_v0 = vunpack.c.l.bf16 %v419_v53  ;;  %v420_v21 = vld [vmem:[%s2798_s28 + $0x108] sm:$0xff]   ;;  %v875_v49 = vld [vmem:[%s2805_s14 + $0x100] sm:$0xff]  }
  0xab   : > { %v3029_v15 = vadd.f32 %v673_v10, %v641_v43  ;;  %v985_v3 = vadd.f32 %v969_v52, %v937_v58  ;;  %v403_v60 = vadd.f32 %v387_v59, %v355_v12  ;;  %v483_v4 = vunpack.c.h.bf16 %v419_v53  ;;  %v3037_v10 = vld [vmem:[%s2798_s28 + $0xf8] sm:$0xff]   ;;  %v516_v53 = vld [vmem:[%s2798_s28 + $0x110] sm:$0xff]   ;;  %v955_v55 = vld [vmem:[%s2805_s14 + $0x108] sm:$0xff]  }
  0xac   : > { %2124 = vmatpush3.xpose.msra.mxu0 %v2845_v30  ;;  %2180 = vmatpush3.xpose.msra.mxu1 %v2845_v30  ;;  %v594_v20 = vadd.f32 %v578_v47, %v546_v54  ;;  %v1161_v7 = vunpack.c.l.bf16 %v3022_v44  ;;  %v1209_v8 = vunpack.c.h.bf16 %v3022_v44  ;;  %v531_v11 = vunpack.c.l.bf16 %v515_v62  ;;  %v3063_v59 = vld [vmem:[%s2798_s28 + $0x118] sm:$0xff]   ;;  %v876_v44 = vld [vmem:[%s2805_s14 + $0x120] sm:$0xff]  }
  0xad   : > { %2125 = vmatprep.subr.mxu0 %v2847_v31  ;;  %2181 = vmatprep.subr.mxu1 %v2847_v31  ;;  %v1033_v16 = vadd.f32 %v1017_v57, %v985_v3  ;;  %v451_v30 = vadd.f32 %v435_v0, %v403_v60  ;;  %v890_v17 = vunpack.c.l.bf16 %v874_v1  ;;  %v922_v22 = vunpack.c.h.bf16 %v874_v1  ;;  %v1051_v3 = vld [vmem:[%s2805_s14 + $0x110] sm:$0xff]   ;;  %v341_v60 = vld [vmem:[%s2798_s28 + $0x120] sm:$0xff]  }
  0xae   : > { %v3041_v27 = vadd.f32 %v1208_v41, %v1176_v37  ;;  %v642_v28 = vadd.f32 %v626_v51, %v594_v20  ;;  %v579_v33 = vunpack.c.h.bf16 %v515_v62  ;;  %v970_v18 = vunpack.c.l.bf16 %v954_v5 }
  0xaf   : > { %v1081_v35 = vadd.f32 %v1065_v24, %v1033_v16  ;;  %v499_v36 = vadd.f32 %v483_v4, %v451_v30  ;;  %v938_v39 = vadd.f32 %v922_v22, %v890_v17  ;;  %v1018_v40 = vunpack.c.h.bf16 %v954_v5 }
  0xb0   : > { %2126 = vmatpush3.xpose.msra.mxu0 %v2847_v31  ;;  %2182 = vmatpush3.xpose.msra.mxu1 %v2847_v31  ;;  %v627_v41 = vunpack.c.l.bf16 %v3037_v10  ;;  %v675_v42 = vunpack.c.h.bf16 %v3037_v10  ;;  %v1066_v34 = vunpack.c.l.bf16 %v1050_v6  ;;  %v356_v31 = vunpack.c.l.bf16 %v340_v23 }
  0xb1   : > { %2127 = vmatprep.subr.mxu0 %v2849_v32  ;;  %2183 = vmatprep.subr.mxu1 %v2849_v32  ;;  %v1129_v45 = vadd.f32 %v1113_v63, %v1081_v35  ;;  %v547_v46 = vadd.f32 %v531_v11, %v499_v36  ;;  %v986_v47 = vadd.f32 %v970_v18, %v938_v39  ;;  %v388_v48 = vunpack.c.h.bf16 %v340_v23  ;;  %v3080_v23 = vld [vmem:[%s2798_s28 + $0x130] sm:$0xff]   ;;  %v956_v39 = vld [vmem:[%s2805_s14 + $0x128] sm:$0xff]  }
  0xb2   : > { %v3054_v50 = vadd.f32 %v674_v56, %v642_v28  ;;  %v1114_v43 = vunpack.c.h.bf16 %v1050_v6  ;;  %v1162_v51 = vunpack.c.l.bf16 %v3046_v9  ;;  %v436_v52 = vunpack.c.l.bf16 %v420_v21 }
  0xb3   : > { %v1177_v29 = vadd.f32 %v1161_v7, %v1129_v45  ;;  %v595_v57 = vadd.f32 %v579_v33, %v547_v46  ;;  %v1034_v58 = vadd.f32 %v1018_v40, %v986_v47  ;;  %v1210_v24 = vunpack.c.h.bf16 %v3046_v9  ;;  %v421_v7 = vld [vmem:[%s2798_s28 + $0x128] sm:$0xff]   ;;  %v1052_v45 = vld [vmem:[%s2805_s14 + $0x130] sm:$0xff]   ;;  %v342_v46 = vld [vmem:[%s2798_s28 + $0x140] sm:$0xff]  }
  0xb4   : > { %2128 = vmatpush3.xpose.msra.mxu0 %v2849_v32  ;;  %2184 = vmatpush3.xpose.msra.mxu1 %v2849_v32  ;;  %v404_v12 = vadd.f32 %v388_v48, %v356_v31  ;;  %v484_v56 = vunpack.c.h.bf16 %v420_v21  ;;  %v891_v62 = vunpack.c.l.bf16 %v875_v49  ;;  %v923_v37 = vunpack.c.h.bf16 %v875_v49 }
  0xb5   : > { %v643_v54 = vadd.f32 %v627_v41, %v595_v57  ;;  %v1082_v63 = vadd.f32 %v1066_v34, %v1034_v58  ;;  %v532_v0 = vunpack.c.l.bf16 %v516_v53  ;;  %v971_v1 = vunpack.c.l.bf16 %v955_v55 }
  0xb6   : > { %v452_v32 = vadd.f32 %v436_v52, %v404_v12  ;;  %v580_v4 = vunpack.c.h.bf16 %v516_v53  ;;  %v939_v5 = vadd.f32 %v923_v37, %v891_v62  ;;  %v1019_v20 = vunpack.c.h.bf16 %v955_v55  ;;  %v422_v53 = vld [vmem:[%s2798_s28 + $0x148] sm:$0xff]   ;;  %v877_v62 = vld [vmem:[%s2805_s14 + $0x140] sm:$0xff]  }
  0xb7   : > { %2130 = vmatmul.mubr.f32.vlgmr.msra.gmra.mxu0 %v2913_v25  ;;  %2186 = vmatmul.mubr.f32.vlgmr.msra.gmra.mxu1 %v2923_v38  ;;  %v1225_v11 = vadd.f32 %v1209_v8, %v1177_v29  ;;  %v1130_v16 = vadd.f32 %v1114_v43, %v1082_v63  ;;  %v628_v30 = vunpack.c.l.bf16 %v3063_v59  ;;  %v676_v25 = vunpack.c.h.bf16 %v3063_v59  ;;  %v3077_v38 = vld [vmem:[%s2805_s14 + $0x118] sm:$0xff]   ;;  %v518_v59 = vld [vmem:[%s2798_s28 + $0x150] sm:$0xff]  }
  0xb8   : > { %2132 = vmatprep.mubr.f32.mxu0 %v2941_v61  ;;  %2188 = vmatprep.mubr.f32.mxu1 %v2955_v13  ;;  %v500_v10 = vadd.f32 %v484_v56, %v452_v32  ;;  %v987_v17 = vadd.f32 %v971_v1, %v939_v5  ;;  %v1067_v22 = vunpack.c.l.bf16 %v1051_v3  ;;  %v357_v6 = vunpack.c.l.bf16 %v341_v60 }
  0xb9   : > { %v691_v61 = vadd.f32 %v675_v42, %v643_v54  ;;  %v1178_v28 = vadd.f32 %v1162_v51, %v1130_v16  ;;  %v389_v13 = vunpack.c.h.bf16 %v341_v60  ;;  %v437_v33 = vunpack.c.l.bf16 %v421_v7  ;;  %v3092_v42 = vld [vmem:[%s2798_s28 + $0x138] sm:$0xff]  }
  0xba   : > { %v548_v8 = vadd.f32 %v532_v0, %v500_v10  ;;  %v1035_v18 = vadd.f32 %v1019_v20, %v987_v17  ;;  %v1115_v35 = vunpack.c.h.bf16 %v1051_v3  ;;  %v1163_v36 = vunpack.c.l.bf16 %v3077_v38  ;;  %v957_v0 = vld [vmem:[%s2805_s14 + $0x148] sm:$0xff]   ;;  %v1053_v10 = vld [vmem:[%s2805_s14 + $0x150] sm:$0xff]   ;;  %v343_v17 = vld [vmem:[%s2798_s28 + $0x160] sm:$0xff]  }
  0xbb   : > { %2133 = vmatmul.mubr.f32.gmra.mxu0 %v2973_v19  ;;  %2189 = vmatmul.mubr.f32.gmra.mxu1 %v2985_v2  ;;  %v1211_v40 = vunpack.c.h.bf16 %v3077_v38  ;;  %v405_v9 = vadd.f32 %v389_v13, %v357_v6  ;;  %v485_v21 = vunpack.c.h.bf16 %v421_v7  ;;  %v533_v19 = vunpack.c.l.bf16 %v3080_v23 }
  0xbc   : > { %2135 = vmatprep.mubr.f32.mxu0 %v2997_v26  ;;  %2191 = vmatprep.mubr.f32.mxu1 %v3013_v14  ;;  %v596_v41 = vadd.f32 %v580_v4, %v548_v8  ;;  %v1083_v2 = vadd.f32 %v1067_v22, %v1035_v18  ;;  %v892_v34 = vunpack.c.l.bf16 %v876_v44  ;;  %v924_v31 = vunpack.c.h.bf16 %v876_v44  ;;  %v614_v4 = vld [vmem:[%s2798_s28 + $0x158] sm:$0xff]  }
  0xbd   : > { %v1226_v47 = vadd.f32 %v1210_v24, %v1178_v28  ;;  %v453_v48 = vadd.f32 %v437_v33, %v405_v9  ;;  %v581_v26 = vunpack.c.h.bf16 %v3080_v23  ;;  %v972_v14 = vunpack.c.l.bf16 %v956_v39  ;;  %v423_v28 = vld [vmem:[%s2798_s28 + $0x168] sm:$0xff]  }
  0xbe   : > { %v644_v49 = vadd.f32 %v628_v30, %v596_v41  ;;  %v1131_v43 = vadd.f32 %v1115_v35, %v1083_v2  ;;  %v940_v51 = vadd.f32 %v924_v31, %v892_v34  ;;  %v1020_v52 = vunpack.c.h.bf16 %v956_v39  ;;  %v519_v2 = vld [vmem:[%s2798_s28 + $0x170] sm:$0xff]  }
  0xbf   : > { %2136 = vmatmul.mubr.f32.gmra.mxu0 %v3029_v15  ;;  %2192 = vmatmul.mubr.f32.gmra.mxu1 %v3041_v27  ;;  %v501_v55 = vadd.f32 %v485_v21, %v453_v48  ;;  %v629_v29 = vunpack.c.l.bf16 %v3092_v42  ;;  %v1068_v57 = vunpack.c.l.bf16 %v1052_v45  ;;  %v358_v58 = vunpack.c.l.bf16 %v342_v46  ;;  %v1148_v27 = vld [vmem:[%s2805_s14 + $0x138] sm:$0xff]  }
  0xc0   : > { %2138 = vmatprep.mubr.f32.mxu0 %v3054_v50  ;;  %2194 = vmatprep.mubr.f32.mxu1 %v1225_v11  ;;  %v692_v15 = vadd.f32 %v676_v25, %v644_v49  ;;  %v1179_v24 = vadd.f32 %v1163_v36, %v1131_v43  ;;  %v988_v12 = vadd.f32 %v972_v14, %v940_v51  ;;  %v390_v56 = vunpack.c.h.bf16 %v342_v46  ;;  %v1149_v36 = vld [vmem:[%s2805_s14 + $0x158] sm:$0xff]  }
  0xc1   : > { %v549_v37 = vadd.f32 %v533_v19, %v501_v55  ;;  %v677_v54 = vunpack.c.h.bf16 %v3092_v42  ;;  %v1116_v63 = vunpack.c.h.bf16 %v1052_v45  ;;  %v438_v50 = vunpack.c.l.bf16 %v422_v53  ;;  %v878_v42 = vld [vmem:[%s2805_s14 + $0x160] sm:$0xff]  }
  0xc2   : > { %v1227_v1 = vadd.f32 %v1211_v40, %v1179_v24  ;;  %v1036_v3 = vadd.f32 %v1020_v52, %v988_v12  ;;  %v406_v60 = vadd.f32 %v390_v56, %v358_v58  ;;  %v486_v32 = vunpack.c.h.bf16 %v422_v53  ;;  %v615_v52 = vld [vmem:[%s2798_s28 + $0x178] sm:$0xff]   ;;  %v344_v12 = vld [vmem:[%s2798_s28 + $0x180] sm:$0xff]  }
  0xc3   : > { %2139 = vmatmul.mubr.f32.gmra.mxu0 %v691_v61  ;;  %2195 = vmatmul.mubr.f32.gmra.mxu1 %v1226_v47  ;;  %v597_v5 = vadd.f32 %v581_v26, %v549_v37  ;;  %v1164_v20 = vunpack.c.l.bf16 %v1148_v27  ;;  %v534_v7 = vunpack.c.l.bf16 %v518_v59  ;;  %v893_v11 = vunpack.c.l.bf16 %v877_v62  ;;  %v958_v47 = vld [vmem:[%s2805_s14 + $0x168] sm:$0xff]  }
  0xc4   : > { %2141 = vmatprep.mubr.f32.mxu0 %v692_v15  ;;  %2197 = vmatprep.mubr.f32.mxu1 %v1227_v1  ;;  %v1084_v16 = vadd.f32 %v1068_v57, %v1036_v3  ;;  %v454_v30 = vadd.f32 %v438_v50, %v406_v60  ;;  %v925_v25 = vunpack.c.h.bf16 %v877_v62  ;;  %v973_v38 = vunpack.c.l.bf16 %v957_v0  ;;  %v424_v37 = vld [vmem:[%s2798_s28 + $0x188] sm:$0xff]   ;;  %v1150_v60 = vld [vmem:[%s2805_s14 + $0x178] sm:$0xff]  }
  0xc5   : > { %v645_v22 = vadd.f32 %v629_v29, %v597_v5  ;;  %v1212_v6 = vunpack.c.h.bf16 %v1148_v27  ;;  %v582_v23 = vunpack.c.h.bf16 %v518_v59  ;;  %v630_v61 = vunpack.c.l.bf16 %v614_v4  ;;  %v1054_v29 = vld [vmem:[%s2805_s14 + $0x170] sm:$0xff]  }
  0xc6   : > { %v1132_v13 = vadd.f32 %v1116_v63, %v1084_v16  ;;  %v502_v33 = vadd.f32 %v486_v32, %v454_v30  ;;  %v941_v44 = vadd.f32 %v925_v25, %v893_v11  ;;  %v1021_v8 = vunpack.c.h.bf16 %v957_v0  ;;  %v520_v5 = vld [vmem:[%s2798_s28 + $0x190] sm:$0xff]  }
  0xc7   : > { %v693_v18 = vadd.f32 %v677_v54, %v645_v22  ;;  %v1069_v35 = vunpack.c.l.bf16 %v1053_v10  ;;  %v359_v39 = vunpack.c.l.bf16 %v343_v17  ;;  %v391_v40 = vunpack.c.h.bf16 %v343_v17  ;;  %v959_v22 = vld [vmem:[%s2805_s14 + $0x188] sm:$0xff]  }
  0xc8   : > { %v1180_v9 = vadd.f32 %v1164_v20, %v1132_v13  ;;  %v550_v21 = vadd.f32 %v534_v7, %v502_v33  ;;  %v989_v19 = vadd.f32 %v973_v38, %v941_v44  ;;  %v439_v41 = vunpack.c.l.bf16 %v423_v28  ;;  %v879_v20 = vld [vmem:[%s2805_s14 + $0x180] sm:$0xff]  }
  0xc9   : > { %2142 = vmatmul.mubr.f32.gmra.mxu0 %v693_v18  ;;  %v678_v34 = vunpack.c.h.bf16 %v614_v4  ;;  %v1117_v31 = vunpack.c.h.bf16 %v1053_v10  ;;  %v407_v45 = vadd.f32 %v391_v40, %v359_v39  ;;  %v487_v46 = vunpack.c.h.bf16 %v423_v28 }
  0xca   : > { %v1228_v48 = vadd.f32 %v1212_v6, %v1180_v9  ;;  %v598_v26 = vadd.f32 %v582_v23, %v550_v21  ;;  %v1037_v14 = vadd.f32 %v1021_v8, %v989_v19  ;;  %v1165_v49 = vunpack.c.l.bf16 %v1149_v36  ;;  %v616_v8 = vld [vmem:[%s2798_s28 + $0x198] sm:$0xff]   ;;  %v425_v19 = vld [vmem:[%s2798_s28 + $0x1a8] sm:$0xff]  }
  0xcb   : > { %v455_v43 = vadd.f32 %v439_v41, %v407_v45  ;;  %v535_v51 = vunpack.c.l.bf16 %v519_v2  ;;  %v894_v53 = vunpack.c.l.bf16 %v878_v42  ;;  %v926_v55 = vunpack.c.h.bf16 %v878_v42 }
  0xcc   : > { %2198 = vmatmul.mubr.f32.gmra.mxu1 %v1228_v48  ;;  %v646_v57 = vadd.f32 %v630_v61, %v598_v26  ;;  %v1085_v58 = vadd.f32 %v1069_v35, %v1037_v14  ;;  %v1213_v15 = vunpack.c.h.bf16 %v1149_v36  ;;  %v974_v24 = vunpack.c.l.bf16 %v958_v47  ;;  %v1055_v35 = vld [vmem:[%s2805_s14 + $0x190] sm:$0xff]   ;;  %v345_v36 = vld [vmem:[%s2798_s28 + $0x1a0] sm:$0xff]  }
  0xcd   : > { %v503_v27 = vadd.f32 %v487_v46, %v455_v43  ;;  %v583_v56 = vunpack.c.h.bf16 %v519_v2  ;;  %v942_v59 = vadd.f32 %v926_v55, %v894_v53  ;;  %v1022_v62 = vunpack.c.h.bf16 %v958_v47  ;;  %v1151_v46 = vld [vmem:[%s2805_s14 + $0x198] sm:$0xff]  }
  0xce   : > { %v694_v54 = vadd.f32 %v678_v34, %v646_v57  ;;  %v1133_v63 = vadd.f32 %v1117_v31, %v1085_v58  ;;  %v631_v50 = vunpack.c.l.bf16 %v615_v52  ;;  %v1070_v0 = vunpack.c.l.bf16 %v1054_v29  ;;  %v960_v58 = vld [vmem:[%s2805_s14 + $0x1a8] sm:$0xff]  }
  0xcf   : > { %v551_v1 = vadd.f32 %v535_v51, %v503_v27  ;;  %v990_v3 = vadd.f32 %v974_v24, %v942_v59  ;;  %v360_v32 = vunpack.c.l.bf16 %v344_v12  ;;  %v392_v4 = vunpack.c.h.bf16 %v344_v12  ;;  %v521_v51 = vld [vmem:[%s2798_s28 + $0x1b0] sm:$0xff]  }
  0xd0   : > { %2144 = vmatprep.mubr.f32.mxu0 %v694_v54  ;;  %v1181_v7 = vadd.f32 %v1165_v49, %v1133_v63  ;;  %v679_v11 = vunpack.c.h.bf16 %v615_v52  ;;  %v1118_v16 = vunpack.c.h.bf16 %v1054_v29  ;;  %v440_v30 = vunpack.c.l.bf16 %v424_v37  ;;  %v880_v52 = vld [vmem:[%s2805_s14 + $0x1a0] sm:$0xff]   ;;  %v1056_v63 = vld [vmem:[%s2805_s14 + $0x1b0] sm:$0xff]  }
  0xd1   : > { %v599_v25 = vadd.f32 %v583_v56, %v551_v1  ;;  %v1038_v38 = vadd.f32 %v1022_v62, %v990_v3  ;;  %v408_v10 = vadd.f32 %v392_v4, %v360_v32  ;;  %v488_v17 = vunpack.c.h.bf16 %v424_v37  ;;  %v617_v62 = vld [vmem:[%s2798_s28 + $0x1b8] sm:$0xff]  }
  0xd2   : > { %v1229_v6 = vadd.f32 %v1213_v15, %v1181_v7  ;;  %v1166_v23 = vunpack.c.l.bf16 %v1150_v60  ;;  %v536_v61 = vunpack.c.l.bf16 %v520_v5  ;;  %v895_v28 = vunpack.c.l.bf16 %v879_v20  ;;  %v426_v7 = vld [vmem:[%s2798_s28 + $0x1c8] sm:$0xff]  }
  0xd3   : > { %v647_v13 = vadd.f32 %v631_v50, %v599_v25  ;;  %v1086_v33 = vadd.f32 %v1070_v0, %v1038_v38  ;;  %v456_v44 = vadd.f32 %v440_v30, %v408_v10  ;;  %v927_v18 = vunpack.c.h.bf16 %v879_v20 }
  0xd4   : > { %2200 = vmatprep.mubr.f32.mxu1 %v1229_v6  ;;  %v1214_v39 = vunpack.c.h.bf16 %v1150_v60  ;;  %v584_v40 = vunpack.c.h.bf16 %v520_v5  ;;  %v975_v9 = vunpack.c.l.bf16 %v959_v22  ;;  %v1023_v21 = vunpack.c.h.bf16 %v959_v22  ;;  %v346_v60 = vld [vmem:[%s2798_s28 + $0x1c0] sm:$0xff]  }
  0xd5   : > { %v695_v41 = vadd.f32 %v679_v11, %v647_v13  ;;  %v1134_v2 = vadd.f32 %v1118_v16, %v1086_v33  ;;  %v504_v42 = vadd.f32 %v488_v17, %v456_v44  ;;  %v943_v34 = vadd.f32 %v927_v18, %v895_v28  ;;  %v1152_v17 = vld [vmem:[%s2805_s14 + $0x1b8] sm:$0xff]  }
  0xd6   : > { %v632_v31 = vunpack.c.l.bf16 %v616_v8  ;;  %v1071_v45 = vunpack.c.l.bf16 %v1055_v35  ;;  %v361_v47 = vunpack.c.l.bf16 %v345_v36  ;;  %v393_v48 = vunpack.c.h.bf16 %v345_v36 }
  0xd7   : > { %2145 = vmatmul.mubr.f32.gmra.mxu0 %v695_v41  ;;  %v1182_v26 = vadd.f32 %v1166_v23, %v1134_v2  ;;  %v552_v14 = vadd.f32 %v536_v61, %v504_v42  ;;  %v991_v49 = vadd.f32 %v975_v9, %v943_v34  ;;  %v441_v43 = vunpack.c.l.bf16 %v425_v19  ;;  %v522_v23 = vld [vmem:[%s2798_s28 + $0x1d0] sm:$0xff]   ;;  %v881_v61 = vld [vmem:[%s2805_s14 + $0x1c0] sm:$0xff]   ;;  %v618_v34 = vld [vmem:[%s2798_s28 + $0x1d8] sm:$0xff]  }
  0xd8   : > { %v680_v53 = vunpack.c.h.bf16 %v616_v8  ;;  %v1119_v55 = vunpack.c.h.bf16 %v1055_v35  ;;  %v409_v29 = vadd.f32 %v393_v48, %v361_v47  ;;  %v489_v57 = vunpack.c.h.bf16 %v425_v19 }
  0xd9   : > { %v1230_v15 = vadd.f32 %v1214_v39, %v1182_v26  ;;  %v600_v24 = vadd.f32 %v584_v40, %v552_v14  ;;  %v1039_v12 = vadd.f32 %v1023_v21, %v991_v49  ;;  %v1167_v27 = vunpack.c.l.bf16 %v1151_v46  ;;  %v961_v39 = vld [vmem:[%s2805_s14 + $0x1c8] sm:$0xff]  }
  0xda   : > { %v457_v56 = vadd.f32 %v441_v43, %v409_v29  ;;  %v537_v59 = vunpack.c.l.bf16 %v521_v51  ;;  %v896_v37 = vunpack.c.l.bf16 %v880_v52  ;;  %v928_v54 = vunpack.c.h.bf16 %v880_v52  ;;  %v427_v49 = vld [vmem:[%s2798_s28 + $0x1e8] sm:$0xff]  }
  0xdb   : > { %2201 = vmatmul.mubr.f32.gmra.mxu1 %v1230_v15  ;;  %v648_v50 = vadd.f32 %v632_v31, %v600_v24  ;;  %v1087_v0 = vadd.f32 %v1071_v45, %v1039_v12  ;;  %v1215_v1 = vunpack.c.h.bf16 %v1151_v46  ;;  %v976_v3 = vunpack.c.l.bf16 %v960_v58  ;;  %v1057_v45 = vld [vmem:[%s2805_s14 + $0x1d0] sm:$0xff]   ;;  %v347_v46 = vld [vmem:[%s2798_s28 + $0x1e0] sm:$0xff]  }
  0xdc   : > { %v505_v32 = vadd.f32 %v489_v57, %v457_v56  ;;  %v585_v4 = vunpack.c.h.bf16 %v521_v51  ;;  %v944_v5 = vadd.f32 %v928_v54, %v896_v37  ;;  %v1024_v20 = vunpack.c.h.bf16 %v960_v58  ;;  %v523_v56 = vld [vmem:[%s2798_s28 + $0x1f0] sm:$0xff]   ;;  %v1153_v37 = vld [vmem:[%s2805_s14 + $0x1d8] sm:$0xff]  }
  0xdd   : > { %v696_v11 = vadd.f32 %v680_v53, %v648_v50  ;;  %v1135_v16 = vadd.f32 %v1119_v55, %v1087_v0  ;;  %v633_v30 = vunpack.c.l.bf16 %v617_v62  ;;  %v1072_v25 = vunpack.c.l.bf16 %v1056_v63  ;;  %v962_v50 = vld [vmem:[%s2805_s14 + $0x1e8] sm:$0xff]  }
  0xde   : > { %v553_v38 = vadd.f32 %v537_v59, %v505_v32  ;;  %v992_v10 = vadd.f32 %v976_v3, %v944_v5  ;;  %v362_v22 = vunpack.c.l.bf16 %v346_v60  ;;  %v394_v6 = vunpack.c.h.bf16 %v346_v60  ;;  %v882_v59 = vld [vmem:[%s2805_s14 + $0x1e0] sm:$0xff]  }
  0xdf   : > { %2147 = vmatprep.mubr.f32.mxu0 %v696_v11  ;;  %v1183_v28 = vadd.f32 %v1167_v27, %v1135_v16  ;;  %v681_v13 = vunpack.c.h.bf16 %v617_v62  ;;  %v1120_v33 = vunpack.c.h.bf16 %v1056_v63  ;;  %v442_v44 = vunpack.c.l.bf16 %v426_v7 }
  0xe0   : > { %v601_v8 = vadd.f32 %v585_v4, %v553_v38  ;;  %v1040_v18 = vadd.f32 %v1024_v20, %v992_v10  ;;  %v410_v35 = vadd.f32 %v394_v6, %v362_v22  ;;  %v490_v36 = vunpack.c.h.bf16 %v426_v7  ;;  %v1058_v38 = vld [vmem:[%s2805_s14 + $0x1f0] sm:$0xff]  }
  0xe1   : > { %v1231_v40 = vadd.f32 %v1215_v1, %v1183_v28  ;;  %v1168_v9 = vunpack.c.l.bf16 %v1152_v17  ;;  %v538_v21 = vunpack.c.l.bf16 %v522_v23  ;;  %v897_v19 = vunpack.c.l.bf16 %v881_v61 }
  0xe2   : > { %v649_v41 = vadd.f32 %v633_v30, %v601_v8  ;;  %v1088_v2 = vadd.f32 %v1072_v25, %v1040_v18  ;;  %v458_v42 = vadd.f32 %v442_v44, %v410_v35  ;;  %v929_v31 = vunpack.c.h.bf16 %v881_v61  ;;  %v619_v30 = vld [vmem:[%s2798_s28 + $0x1f8] sm:$0xff]  }
  0xe3   : > { %2203 = vmatprep.mubr.f32.mxu1 %v1231_v40  ;;  %v1216_v47 = vunpack.c.h.bf16 %v1152_v17  ;;  %v586_v48 = vunpack.c.h.bf16 %v522_v23  ;;  %v977_v26 = vunpack.c.l.bf16 %v961_v39  ;;  %v1025_v14 = vunpack.c.h.bf16 %v961_v39  ;;  %v1154_v35 = vld [vmem:[%s2805_s14 + $0x1f8] sm:$0xff]  }
  0xe4   : > { %v697_v43 = vadd.f32 %v681_v13, %v649_v41  ;;  %v1136_v51 = vadd.f32 %v1120_v33, %v1088_v2  ;;  %v506_v52 = vadd.f32 %v490_v36, %v458_v42  ;;  %v945_v53 = vadd.f32 %v929_v31, %v897_v19 }
  0xe5   : > { %v634_v55 = vunpack.c.l.bf16 %v618_v34  ;;  %v1073_v29 = vunpack.c.l.bf16 %v1057_v45  ;;  %v363_v57 = vunpack.c.l.bf16 %v347_v46  ;;  %v395_v58 = vunpack.c.h.bf16 %v347_v46 }
  0xe6   : > { %2148 = vmatmul.mubr.f32.gmra.mxu0 %v697_v43  ;;  %v1184_v15 = vadd.f32 %v1168_v9, %v1136_v51  ;;  %v554_v24 = vadd.f32 %v538_v21, %v506_v52  ;;  %v993_v12 = vadd.f32 %v977_v26, %v945_v53  ;;  %v443_v27 = vunpack.c.l.bf16 %v427_v49 }
  0xe7   : > { %v682_v62 = vunpack.c.h.bf16 %v618_v34  ;;  %v411_v54 = vadd.f32 %v395_v58, %v363_v57  ;;  %v491_v63 = vunpack.c.h.bf16 %v427_v49  ;;  %v1121_v60 = vunpack.c.h.bf16 %v1057_v45 }
  0xe8   : > { %v1232_v0 = vadd.f32 %v1216_v47, %v1184_v15  ;;  %v602_v1 = vadd.f32 %v586_v48, %v554_v24  ;;  %v1041_v3 = vadd.f32 %v1025_v14, %v993_v12  ;;  %v539_v4 = vunpack.c.l.bf16 %v523_v56  ;;  %v3153_v47 = vld [vmem:[%s3368_s3] ss:$0 sm:$0xff] }
  0xe9   : > { %v459_v32 = vadd.f32 %v443_v27, %v411_v54  ;;  %v898_v5 = vunpack.c.l.bf16 %v882_v59  ;;  %v930_v20 = vunpack.c.h.bf16 %v882_v59  ;;  %v1169_v16 = vunpack.c.l.bf16 %v1153_v37 }
  0xea   : > { %2204 = vmatmul.mubr.f32.gmra.mxu1 %v1232_v0  ;;  %v650_v7 = vadd.f32 %v634_v55, %v602_v1  ;;  %v1089_v11 = vadd.f32 %v1073_v29, %v1041_v3  ;;  %v978_v25 = vunpack.c.l.bf16 %v962_v50  ;;  %v587_v17 = vunpack.c.h.bf16 %v523_v56 }
  0xeb   : > { %v507_v10 = vadd.f32 %v491_v63, %v459_v32  ;;  %v946_v22 = vadd.f32 %v930_v20, %v898_v5  ;;  %v1026_v6 = vunpack.c.h.bf16 %v962_v50  ;;  %v1217_v28 = vunpack.c.h.bf16 %v1153_v37 }
  0xec   : > { %v698_v23 = vadd.f32 %v682_v62, %v650_v7  ;;  %v1137_v61 = vadd.f32 %v1121_v60, %v1089_v11  ;;  %v635_v33 = vunpack.c.l.bf16 %v619_v30  ;;  %v1074_v8 = vunpack.c.l.bf16 %v1058_v38 }
  0xed   : > { %v555_v13 = vadd.f32 %v539_v4, %v507_v10  ;;  %v994_v44 = vadd.f32 %v978_v25, %v946_v22  ;;  %v683_v39 = vunpack.c.h.bf16 %v619_v30  ;;  %v1122_v9 = vunpack.c.h.bf16 %v1058_v38 }
  0xee   : > { %2150 = vmatprep.mubr.f32.mxu0 %v698_v23  ;;  %v1185_v18 = vadd.f32 %v1169_v16, %v1137_v61  ;;  %v1170_v2 = vunpack.c.l.bf16 %v1154_v35  ;;  %v1218_v31 = vunpack.c.h.bf16 %v1154_v35 }
  0xef   : > { %v603_v36 = vadd.f32 %v587_v17, %v555_v13  ;;  %v1042_v40 = vadd.f32 %v1026_v6, %v994_v44 }
  0xf0   : > { %v1233_v21 = vadd.f32 %v1217_v28, %v1185_v18 }
  0xf1   : > { %v651_v19 = vadd.f32 %v635_v33, %v603_v36  ;;  %v1090_v41 = vadd.f32 %v1074_v8, %v1042_v40 }
  0xf2   : > { %2206 = vmatprep.mubr.f32.mxu1 %v1233_v21 }
  0xf3   : > { %v699_v42 = vadd.f32 %v683_v39, %v651_v19  ;;  %v1138_v34 = vadd.f32 %v1122_v9, %v1090_v41 }
  0xf5   : > { %2151 = vmatmul.mubr.f32.gmra.mxu0 %v699_v42  ;;  %v1186_v45 = vadd.f32 %v1170_v2, %v1138_v34 }
  0xf7   : > { %v1234_v46 = vadd.f32 %v1218_v31, %v1186_v45 }
  0xf9   : > { %2207 = vmatmul.mubr.f32.gmra.mxu1 %v1234_v46 }
 0x177   : > { %v2131_v48 = vpop.f32.mrf.mxu0  ;;  %v2187_v26 = vpop.f32.mrf.mxu1 }
 0x178   : > { %v778_v14 = vadd.f32 %v2131_v48, %v3153_v47  ;;  %v1307_v49 = vadd.f32 %v2187_v26, %v3153_v47 }
 0x179   : > { %v772_v43 = vpop.f32.mrf.mxu0  ;;  %v1301_v51 = vpop.f32.mrf.mxu1 }
 0x17a   : > { %2324 = vtanh.f32 %v778_v14  ;;  %v773_v52 = vadd.f32 %v3153_v47, %v772_v43  ;;  %v1302_v53 = vadd.f32 %v3153_v47, %v1301_v51 }
 0x17b   : > { %2326 = vtanh.f32 %v1307_v49  ;;  %v2134_v55 = vpop.f32.mrf.mxu0  ;;  %v2190_v29 = vpop.f32.mrf.mxu1 }
 0x17c   : > { %2328 = vtanh.f32 %v773_v52  ;;  %v788_v57 = vadd.f32 %v2134_v55, %v3153_v47  ;;  %v1317_v58 = vadd.f32 %v2190_v29, %v3153_v47 }
 0x17d   : > { %2330 = vtanh.f32 %v1302_v53  ;;  %v782_v15 = vpop.f32.mrf.mxu0  ;;  %v1311_v24 = vpop.f32.mrf.mxu1 }
 0x17e   : > { %2332 = vtanh.f32 %v788_v57  ;;  %v783_v12 = vadd.f32 %v3153_v47, %v782_v15  ;;  %v1312_v27 = vadd.f32 %v3153_v47, %v1311_v24 }
 0x17f   : > { %2334 = vtanh.f32 %v1317_v58  ;;  %v2137_v62 = vpop.f32.mrf.mxu0  ;;  %v2193_v1 = vpop.f32.mrf.mxu1 }
 0x180   : > { %2336 = vtanh.f32 %v783_v12  ;;  %v798_v0 = vadd.f32 %v2137_v62, %v3153_v47  ;;  %v1327_v60 = vadd.f32 %v2193_v1, %v3153_v47 }
 0x181   : > { %2338 = vtanh.f32 %v1312_v27  ;;  %v792_v20 = vpop.f32.mrf.mxu0  ;;  %v1321_v25 = vpop.f32.mrf.mxu1 }
 0x182   : > { %2340 = vtanh.f32 %v798_v0  ;;  %v793_v30 = vadd.f32 %v3153_v47, %v792_v20  ;;  %v1322_v17 = vadd.f32 %v3153_v47, %v1321_v25 }
 0x183   : > { %2342 = vtanh.f32 %v1327_v60  ;;  %v2140_v10 = vpop.f32.mrf.mxu0  ;;  %v2196_v28 = vpop.f32.mrf.mxu1 }
 0x184   : > { %2344 = vtanh.f32 %v793_v30  ;;  %v808_v23 = vadd.f32 %v2140_v10, %v3153_v47  ;;  %v1337_v36 = vadd.f32 %v2196_v28, %v3153_v47 }
 0x185   : > { %v802_v61 = vpop.f32.mrf.mxu0  ;;  %2346 = vtanh.f32 %v1322_v17  ;;  %v1331_v39 = vpop.f32.mrf.mxu1 }
 0x186   : > { %v803_v33 = vadd.f32 %v3153_v47, %v802_v61  ;;  %2348 = vtanh.f32 %v808_v23  ;;  %v1332_v2 = vadd.f32 %v3153_v47, %v1331_v39 }
 0x187   : > { %v2325_v56 = vpop.eup %2324 }
 0x188   : > { %v2327_v59 = vpop.eup %2326  ;;  %v1445_v4 = vmul.f32 %v2325_v56, %v2325_v56  ;;  %2350 = vtanh.f32 %v803_v33 }
 0x189   : > { %v2329_v37 = vpop.eup %2328  ;;  %v1397_v54 = vmul.f32 %v2327_v59, %v2325_v56  ;;  %v1493_v11 = vmul.f32 %v2327_v59, %v2327_v59  ;;  %v2143_v8 = vpop.f32.mrf.mxu0  ;;  %2352 = vtanh.f32 %v1337_v36 }
 0x18a   : > { %v1444_v63 = vmul.f32 %v2329_v37, %v2329_v37  ;;  %v2331_v50 = vpop.eup %2330  ;;  %v818_v21 = vadd.f32 %v2143_v8, %v3153_v47 }
 0x18b   : > { %1414 = vadd.xlane.f32.xlu0 %v1397_v54  ;;  %v2333_v3 = vpop.eup %2332  ;;  %v1492_v5 = vmul.f32 %v2331_v50, %v2331_v50  ;;  %v1396_v22 = vmul.f32 %v2331_v50, %v2329_v37  ;;  %v812_v41 = vpop.f32.mrf.mxu0 }
 0x18c   : > { %1460 = vadd.xlane.f32.xlu1 %v1444_v63  ;;  %v2335_v32 = vpop.eup %2334  ;;  %v1447_v13 = vmul.f32 %v2333_v3, %v2333_v3  ;;  %v2199_v34 = vpop.f32.mrf.mxu1  ;;  %v813_v31 = vadd.f32 %v3153_v47, %v812_v41  ;;  %2354 = vtanh.f32 %v818_v21 }
 0x18d   : > { %v1399_v7 = vmul.f32 %v2335_v32, %v2333_v3  ;;  %v2337_v16 = vpop.eup %2336  ;;  %v1495_v40 = vmul.f32 %v2335_v32, %v2335_v32  ;;  %2356 = vtanh.f32 %v1332_v2  ;;  %v1347_v48 = vadd.f32 %v2199_v34, %v3153_v47 }
 0x18e   : > { %v2339_v38 = vpop.eup %2338  ;;  %v1446_v44 = vmul.f32 %v2337_v16, %v2337_v16  ;;  %v1341_v26 = vpop.f32.mrf.mxu1  ;;  %2358 = vtanh.f32 %v813_v31 }
 0x18f   : > { %1462 = vadd.xlane.f32.xlu0 %v1445_v4  ;;  %v1398_v6 = vmul.f32 %v2339_v38, %v2337_v16  ;;  %v2341_v18 = vpop.eup %2340  ;;  %v1494_v9 = vmul.f32 %v2339_v38, %v2339_v38  ;;  %v1342_v55 = vadd.f32 %v3153_v47, %v1341_v26  ;;  %2360 = vtanh.f32 %v1347_v48 }
 0x190   : > { %1508 = vadd.xlane.f32.xlu1 %v1492_v5  ;;  %v2343_v35 = vpop.eup %2342  ;;  %v1449_v19 = vmul.f32 %v2341_v18, %v2341_v18 }
 0x191   : > { %v1401_v42 = vmul.f32 %v2343_v35, %v2341_v18  ;;  %v2345_v45 = vpop.eup %2344  ;;  %v1497_v14 = vmul.f32 %v2343_v35, %v2343_v35 }
 0x192   : > { %v2347_v49 = vpop.eup %2346  ;;  %v1448_v43 = vmul.f32 %v2345_v45, %v2345_v45 }
 0x193   : > { %1510 = vadd.xlane.f32.xlu0 %v1493_v11  ;;  %v3175_v53 = vpop.eup %2348  ;;  %v1400_v57 = vmul.f32 %v2347_v49, %v2345_v45  ;;  %v1496_v15 = vmul.f32 %v2347_v49, %v2347_v49 }
 0x194   : > { %1418 = vadd.xlane.f32.xlu1 %v1399_v7  ;;  %v1451_v12 = vmul.f32 %v3175_v53, %v3175_v53 }
 0x195   : > { %v3179_v24 = vpop.eup %2350 }
 0x196   : > { %v3184_v62 = vpop.eup %2352  ;;  %v1450_v37 = vmul.f32 %v3179_v24, %v3179_v24 }
 0x197   : > { %1412 = vadd.xlane.f32.xlu0 %v1396_v22  ;;  %v2146_v46 = vpop.f32.mrf.mxu0  ;;  %v1499_v63 = vmul.f32 %v3184_v62, %v3184_v62 }
 0x198   : > { %1416 = vadd.xlane.f32.xlu1 %v1398_v6  ;;  %v828_v51 = vadd.f32 %v2146_v46, %v3153_v47 }
 0x199   : > { %v822_v52 = vpop.f32.mrf.mxu0  ;;  %v3191_v0 = vpop.eup %2354 }
 0x19a   : > { %v823_v58 = vadd.f32 %v3153_v47, %v822_v52  ;;  %2362 = vtanh.f32 %v828_v51  ;;  %v3194_v3 = vpop.eup %2356  ;;  %v1453_v20 = vmul.f32 %v3191_v0, %v3191_v0 }
 0x19b   : > { %1466 = vadd.xlane.f32.xlu0 %v1447_v13  ;;  %v2202_v29 = vpop.f32.mrf.mxu1  ;;  %2364 = vtanh.f32 %v1342_v55  ;;  %v1498_v4 = vmul.f32 %v3194_v3, %v3194_v3  ;;  %v3199_v5 = vpop.eup %2358  ;;  %v1402_v55 = vmul.f32 %v3194_v3, %v3179_v24 }
 0x19c   : > { %1464 = vadd.xlane.f32.xlu1 %v1446_v44  ;;  %v1357_v56 = vadd.f32 %v2202_v29, %v3153_v47  ;;  %2366 = vtanh.f32 %v823_v58  ;;  %v3204_v16 = vpop.eup %2360  ;;  %v1452_v30 = vmul.f32 %v3199_v5, %v3199_v5  ;;  %v1403_v29 = vmul.f32 %v3184_v62, %v3175_v53 }
 0x19d   : > { %v1351_v59 = vpop.f32.mrf.mxu1  ;;  %v1501_v10 = vmul.f32 %v3204_v16, %v3204_v16  ;;  %v1405_v58 = vmul.f32 %v3204_v16, %v3191_v0 }
 0x19e   : > { %v1352_v1 = vadd.f32 %v3153_v47, %v1351_v59  ;;  %2368 = vtanh.f32 %v1357_v56 }
 0x19f   : > { %1514 = vadd.xlane.f32.xlu0 %v1495_v40 }
 0x1a0   : > { %1512 = vadd.xlane.f32.xlu1 %v1494_v9 }
 0x1a3   : > { %1470 = vadd.xlane.f32.xlu0 %v1449_v19 }
 0x1a4   : > { %1422 = vadd.xlane.f32.xlu1 %v1401_v42 }
 0x1a6   : > { %v2149_v27 = vpop.f32.mrf.mxu0 }
 0x1a7   : > { %1518 = vadd.xlane.f32.xlu0 %v1497_v14  ;;  %v838_v54 = vadd.f32 %v2149_v27, %v3153_v47  ;;  %v3211_v17 = vpop.eup %2362 }
 0x1a8   : > { %1468 = vadd.xlane.f32.xlu1 %v1448_v43  ;;  %v832_v50 = vpop.f32.mrf.mxu0  ;;  %v2365_v23 = vpop.eup %2364  ;;  %v1455_v44 = vmul.f32 %v3211_v17, %v3211_v17 }
 0x1a9   : > { %v833_v32 = vadd.f32 %v3153_v47, %v832_v50  ;;  %2370 = vtanh.f32 %v838_v54  ;;  %v1500_v13 = vmul.f32 %v2365_v23, %v2365_v23  ;;  %v2367_v33 = vpop.eup %2366 }
 0x1aa   : > { %v2205_v60 = vpop.f32.mrf.mxu1  ;;  %2372 = vtanh.f32 %v1352_v1  ;;  %v1454_v36 = vmul.f32 %v2367_v33, %v2367_v33 }
 0x1ab   : > { %1420 = vadd.xlane.f32.xlu0 %v1400_v57  ;;  %v1367_v7 = vadd.f32 %v2205_v60, %v3153_v47  ;;  %2374 = vtanh.f32 %v833_v32  ;;  %v2369_v35 = vpop.eup %2368  ;;  %v1404_v57 = vmul.f32 %v2365_v23, %v3199_v5 }
 0x1ac   : > { %1516 = vadd.xlane.f32.xlu1 %v1496_v15  ;;  %v1361_v11 = vpop.f32.mrf.mxu1  ;;  %v1503_v39 = vmul.f32 %v2369_v35, %v2369_v35 }
 0x1ad   : > { %v1362_v22 = vadd.f32 %v3153_v47, %v1361_v11  ;;  %2376 = vtanh.f32 %v1367_v7 }
 0x1af   : > { %1474 = vadd.xlane.f32.xlu0 %v1451_v12  ;;  %v1407_v12 = vmul.f32 %v2369_v35, %v3211_v17 }
 0x1b0   : > { %1472 = vadd.xlane.f32.xlu1 %v1450_v37 }
 0x1b3   : > { %1522 = vadd.xlane.f32.xlu0 %v1499_v63 }
 0x1b4   : > { %1520 = vadd.xlane.f32.xlu1 %v1498_v4 }
 0x1b5   : > { %v2152_v25 = vpop.f32.mrf.mxu0 }
 0x1b6   : > { %v848_v38 = vadd.f32 %v2152_v25, %v3153_v47  ;;  %v2371_v40 = vpop.eup %2370 }
 0x1b7   : > { %1478 = vadd.xlane.f32.xlu0 %v1453_v20  ;;  %v842_v6 = vpop.f32.mrf.mxu0  ;;  %v2373_v21 = vpop.eup %2372  ;;  %v1457_v2 = vmul.f32 %v2371_v40, %v2371_v40 }
 0x1b8   : > { %1476 = vadd.xlane.f32.xlu1 %v1452_v30  ;;  %v843_v28 = vadd.f32 %v3153_v47, %v842_v6  ;;  %2378 = vtanh.f32 %v848_v38  ;;  %v1502_v19 = vmul.f32 %v2373_v21, %v2373_v21  ;;  %v2375_v41 = vpop.eup %2374  ;;  %v1406_v15 = vmul.f32 %v2373_v21, %v2367_v33 }
 0x1b9   : > { %v2208_v61 = vpop.f32.mrf.mxu1  ;;  %2380 = vtanh.f32 %v1362_v22  ;;  %v1456_v34 = vmul.f32 %v2375_v41, %v2375_v41 }
 0x1ba   : > { %v1377_v8 = vadd.f32 %v2208_v61, %v3153_v47  ;;  %2382 = vtanh.f32 %v843_v28  ;;  %v2377_v42 = vpop.eup %2376 }
 0x1bb   : > { %1526 = vadd.xlane.f32.xlu0 %v1501_v10  ;;  %v1371_v18 = vpop.f32.mrf.mxu1  ;;  %v1505_v31 = vmul.f32 %v2377_v42, %v2377_v42  ;;  %v1409_v56 = vmul.f32 %v2377_v42, %v2371_v40 }
 0x1bc   : > { %1524 = vadd.xlane.f32.xlu1 %v1500_v13  ;;  %v1372_v9 = vadd.f32 %v3153_v47, %v1371_v18  ;;  %2384 = vtanh.f32 %v1377_v8 }
 0x1be   : > { %2386 = vtanh.f32 %v1372_v9 }
 0x1bf   : > { %1482 = vadd.xlane.f32.xlu0 %v1455_v44 }
 0x1c0   : > { %1480 = vadd.xlane.f32.xlu1 %v1454_v36 }
 0x1c3   : > { %1530 = vadd.xlane.f32.xlu0 %v1503_v39 }
 0x1c4   : > { %1528 = vadd.xlane.f32.xlu1 %v1502_v19 }
 0x1c5   : > { %v2379_v45 = vpop.eup %2378 }
 0x1c6   : > { %v2381_v46 = vpop.eup %2380  ;;  %v1459_v47 = vmul.f32 %v2379_v45, %v2379_v45 }
 0x1c7   : > { %1486 = vadd.xlane.f32.xlu0 %v1457_v2  ;;  %v1504_v48 = vmul.f32 %v2381_v46, %v2381_v46  ;;  %v2383_v26 = vpop.eup %2382  ;;  %v1408_v27 = vmul.f32 %v2381_v46, %v2375_v41 }
 0x1c8   : > { %1484 = vadd.xlane.f32.xlu1 %v1456_v34  ;;  %v1458_v49 = vmul.f32 %v2383_v26, %v2383_v26 }
 0x1c9   : > { %v2385_v14 = vpop.eup %2384 }
 0x1ca   : > { %v1507_v43 = vmul.f32 %v2385_v14, %v2385_v14  ;;  %v1411_v53 = vmul.f32 %v2385_v14, %v2379_v45 }
 0x1cb   : > { %1534 = vadd.xlane.f32.xlu0 %v1505_v31  ;;  %v2387_v51 = vpop.eup %2386 }
 0x1cc   : > { %1532 = vadd.xlane.f32.xlu1 %v1504_v48  ;;  %v1506_v52 = vmul.f32 %v2387_v51, %v2387_v51  ;;  %v1410_v24 = vmul.f32 %v2387_v51, %v2383_v26 }
 0x1cf   : > { %1490 = vadd.xlane.f32.xlu0 %v1459_v47 }
 0x1d0   : > { %1488 = vadd.xlane.f32.xlu1 %v1458_v49 }
 0x1d3   : > { %1538 = vadd.xlane.f32.xlu0 %v1507_v43 }
 0x1d4   : > { %1536 = vadd.xlane.f32.xlu1 %v1506_v52 }
 0x1d7   : > { %1424 = vadd.xlane.f32.xlu0 %v1402_v55 }
 0x1d8   : > { %1426 = vadd.xlane.f32.xlu1 %v1403_v29 }
 0x1db   : > { %1428 = vadd.xlane.f32.xlu0 %v1404_v57 }
 0x1dc   : > { %1430 = vadd.xlane.f32.xlu1 %v1405_v58 }
 0x1df   : > { %1432 = vadd.xlane.f32.xlu0 %v1406_v15 }
 0x1e0   : > { %1434 = vadd.xlane.f32.xlu1 %v1407_v12 }
 0x1e3   : > { %1436 = vadd.xlane.f32.xlu0 %v1408_v27 }
 0x1e4   : > { %1438 = vadd.xlane.f32.xlu1 %v1409_v56 }
 0x1e7   : > { %1440 = vadd.xlane.f32.xlu0 %v1410_v24 }
 0x1e8   : > { %1442 = vadd.xlane.f32.xlu1 %v1411_v53 }
 0x214   : > { %v1415_v59 = vpop.xlane.xlu0 %1414 }
 0x215   : > { %v1461_v62 = vpop.xlane.xlu1 %1460 }
 0x218   : > { %v1463_v37 = vpop.xlane.xlu0 %1462 }
 0x219   : > { %v1509_v54 = vpop.xlane.xlu1 %1508 }
 0x21a   : > { %v1540_v63 = vmul.f32 %v1509_v54, %v1461_v62 }
 0x21c   : > { %v1556_v50 = vmax.f32 %v1540_v63, 1e-16  ;;  %v1511_v0 = vpop.xlane.xlu0 %1510 }
 0x21d   : > { %v1541_v1 = vmul.f32 %v1511_v0, %v1463_v37  ;;  %v1419_v3 = vpop.xlane.xlu1 %1418 }
 0x21e   : > { %2388 = vrsqrt.f32 %v1556_v50 }
 0x21f   : > { %v1557_v60 = vmax.f32 %v1541_v1, 1e-16 }
 0x220   : > { %v1413_v32 = vpop.xlane.xlu0 %1412 }
 0x221   : > { %2390 = vrsqrt.f32 %v1557_v60  ;;  %v1417_v4 = vpop.xlane.xlu1 %1416 }
 0x224   : > { %v1467_v5 = vpop.xlane.xlu0 %1466 }
 0x225   : > { %v1465_v20 = vpop.xlane.xlu1 %1464 }
 0x228   : > { %v1515_v7 = vpop.xlane.xlu0 %1514 }
 0x229   : > { %v1543_v11 = vmul.f32 %v1515_v7, %v1467_v5  ;;  %v1513_v16 = vpop.xlane.xlu1 %1512 }
 0x22a   : > { %v1542_v30 = vmul.f32 %v1513_v16, %v1465_v20 }
 0x22b   : > { %v2389_v25 = vpop.eup %2388  ;;  %v1559_v38 = vmax.f32 %v1543_v11, 1e-16 }
 0x22c   : > { %v1588_v10 = vmul.f32 %v2389_v25, %v1413_v32  ;;  %v1558_v17 = vmax.f32 %v1542_v30, 1e-16  ;;  %v1471_v22 = vpop.xlane.xlu0 %1470 }
 0x22d   : > { %2392 = vrsqrt.f32 %v1559_v38  ;;  %v1423_v6 = vpop.xlane.xlu1 %1422 }
 0x22e   : > { %v2391_v23 = vpop.eup %2390  ;;  %1605 = vst.msk [vmem:[%s3228_s29] sm:$0xff] %vm1604_vm0, %v1588_v10  ;;  %2394 = vrsqrt.f32 %v1558_v17 }
 0x22f   : > { %v1589_v61 = vmul.f32 %v2391_v23, %v1415_v59 }
 0x230   : > { %v1519_v28 = vpop.xlane.xlu0 %1518 }
 0x231   : > { %1606 = vst.msk [vmem:[%s3228_s29 + $0x8] sm:$0xff] %vm1604_vm0, %v1589_v61  ;;  %v1545_v13 = vmul.f32 %v1519_v28, %v1471_v22  ;;  %v1469_v33 = vpop.xlane.xlu1 %1468 }
 0x233   : > { %v1561_v44 = vmax.f32 %v1545_v13, 1e-16 }
 0x234   : > { %v1421_v8 = vpop.xlane.xlu0 %1420 }
 0x235   : > { %2396 = vrsqrt.f32 %v1561_v44  ;;  %v1517_v18 = vpop.xlane.xlu1 %1516 }
 0x236   : > { %v1544_v35 = vmul.f32 %v1517_v18, %v1469_v33 }
 0x238   : > { %v1560_v36 = vmax.f32 %v1544_v35, 1e-16  ;;  %v1475_v39 = vpop.xlane.xlu0 %1474 }
 0x239   : > { %v1473_v40 = vpop.xlane.xlu1 %1472 }
 0x23a   : > { %v2393_v9 = vpop.eup %2392  ;;  %2398 = vrsqrt.f32 %v1560_v36 }
 0x23b   : > { %v2395_v21 = vpop.eup %2394  ;;  %v1591_v19 = vmul.f32 %v2393_v9, %v1419_v3 }
 0x23c   : > { %v1590_v41 = vmul.f32 %v2395_v21, %v1417_v4  ;;  %v1523_v2 = vpop.xlane.xlu0 %1522 }
 0x23d   : > { %1608 = vst.msk [vmem:[%s3228_s29 + $0x18] sm:$0xff] %vm1604_vm0, %v1591_v19  ;;  %v1521_v42 = vpop.xlane.xlu1 %1520  ;;  %v1547_v52 = vmul.f32 %v1523_v2, %v1475_v39 }
 0x23e   : > { %1607 = vst.msk [vmem:[%s3228_s29 + $0x10] sm:$0xff] %vm1604_vm0, %v1590_v41  ;;  %v1546_v51 = vmul.f32 %v1521_v42, %v1473_v40 }
 0x23f   : > { %v1563_v15 = vmax.f32 %v1547_v52, 1e-16 }
 0x240   : > { %v1479_v34 = vpop.xlane.xlu0 %1478  ;;  %v1562_v57 = vmax.f32 %v1546_v51, 1e-16 }
 0x241   : > { %v1477_v31 = vpop.xlane.xlu1 %1476 }
 0x242   : > { %v2397_v45 = vpop.eup %2396  ;;  %2400 = vrsqrt.f32 %v1562_v57 }
 0x243   : > { %v1593_v46 = vmul.f32 %v2397_v45, %v1423_v6  ;;  %2402 = vrsqrt.f32 %v1563_v15 }
 0x244   : > { %v1527_v48 = vpop.xlane.xlu0 %1526 }
 0x245   : > { %1610 = vst.msk [vmem:[%s3228_s29 + $0x28] sm:$0xff] %vm1604_vm0, %v1593_v46  ;;  %v1525_v26 = vpop.xlane.xlu1 %1524  ;;  %v1549_v12 = vmul.f32 %v1527_v48, %v1479_v34 }
 0x246   : > { %v1548_v58 = vmul.f32 %v1525_v26, %v1477_v31 }
 0x247   : > { %v2399_v47 = vpop.eup %2398  ;;  %v1565_v59 = vmax.f32 %v1549_v12, 1e-16 }
 0x248   : > { %v1592_v14 = vmul.f32 %v2399_v47, %v1421_v8  ;;  %v1483_v49 = vpop.xlane.xlu0 %1482  ;;  %v1564_v24 = vmax.f32 %v1548_v58, 1e-16 }
 0x249   : > { %v1481_v43 = vpop.xlane.xlu1 %1480 }
 0x24a   : > { %1609 = vst.msk [vmem:[%s3228_s29 + $0x20] sm:$0xff] %vm1604_vm0, %v1592_v14  ;;  %2404 = vrsqrt.f32 %v1564_v24 }
 0x24b   : > { %2406 = vrsqrt.f32 %v1565_v59 }
 0x24c   : > { %v1531_v55 = vpop.xlane.xlu0 %1530 }
 0x24d   : > { %v1529_v29 = vpop.xlane.xlu1 %1528  ;;  %v1551_v62 = vmul.f32 %v1531_v55, %v1483_v49 }
 0x24e   : > { %v1550_v53 = vmul.f32 %v1529_v29, %v1481_v43 }
 0x24f   : > { %v1567_v0 = vmax.f32 %v1551_v62, 1e-16  ;;  %v2401_v16 = vpop.eup %2400 }
 0x250   : > { %v1487_v27 = vpop.xlane.xlu0 %1486  ;;  %v1566_v63 = vmax.f32 %v1550_v53, 1e-16  ;;  %v2403_v10 = vpop.eup %2402 }
 0x251   : > { %v1485_v56 = vpop.xlane.xlu1 %1484 }
 0x252   : > { %2408 = vrsqrt.f32 %v1566_v63 }
 0x253   : > { %2410 = vrsqrt.f32 %v1567_v0 }
 0x254   : > { %v1535_v37 = vpop.xlane.xlu0 %1534 }
 0x255   : > { %v1533_v54 = vpop.xlane.xlu1 %1532  ;;  %v1553_v1 = vmul.f32 %v1535_v37, %v1487_v27 }
 0x256   : > { %v1552_v50 = vmul.f32 %v1533_v54, %v1485_v56 }
 0x257   : > { %v1569_v4 = vmax.f32 %v1553_v1, 1e-16  ;;  %v2405_v23 = vpop.eup %2404 }
 0x258   : > { %v1491_v3 = vpop.xlane.xlu0 %1490  ;;  %v1568_v32 = vmax.f32 %v1552_v50, 1e-16  ;;  %v2407_v28 = vpop.eup %2406 }
 0x259   : > { %v1489_v60 = vpop.xlane.xlu1 %1488 }
 0x25a   : > { %2412 = vrsqrt.f32 %v1568_v32 }
 0x25b   : > { %2414 = vrsqrt.f32 %v1569_v4 }
 0x25c   : > { %v1539_v5 = vpop.xlane.xlu0 %1538 }
 0x25d   : > { %v1555_v20 = vmul.f32 %v1539_v5, %v1491_v3  ;;  %v1537_v7 = vpop.xlane.xlu1 %1536 }
 0x25e   : > { %v1554_v11 = vmul.f32 %v1537_v7, %v1489_v60 }
 0x25f   : > { %v1571_v30 = vmax.f32 %v1555_v20, 1e-16  ;;  %v2409_v8 = vpop.eup %2408 }
 0x260   : > { %v1570_v25 = vmax.f32 %v1554_v11, 1e-16  ;;  %v1425_v38 = vpop.xlane.xlu0 %1424  ;;  %v2411_v35 = vpop.eup %2410 }
 0x261   : > { %v1594_v17 = vmul.f32 %v2401_v16, %v1425_v38  ;;  %v1427_v22 = vpop.xlane.xlu1 %1426 }
 0x262   : > { %2416 = vrsqrt.f32 %v1570_v25  ;;  %v1595_v6 = vmul.f32 %v2403_v10, %v1427_v22 }
 0x263   : > { %1611 = vst.msk [vmem:[%s3228_s29 + $0x30] sm:$0xff] %vm1604_vm0, %v1594_v17  ;;  %2418 = vrsqrt.f32 %v1571_v30 }
 0x264   : > { %1612 = vst.msk [vmem:[%s3228_s29 + $0x38] sm:$0xff] %vm1604_vm0, %v1595_v6  ;;  %v1429_v61 = vpop.xlane.xlu0 %1428 }
 0x265   : > { %v1596_v13 = vmul.f32 %v2405_v23, %v1429_v61  ;;  %v1431_v33 = vpop.xlane.xlu1 %1430 }
 0x266   : > { %v1597_v44 = vmul.f32 %v2407_v28, %v1431_v33 }
 0x267   : > { %1613 = vst.msk [vmem:[%s3228_s29 + $0x40] sm:$0xff] %vm1604_vm0, %v1596_v13  ;;  %v2413_v9 = vpop.eup %2412 }
 0x268   : > { %1614 = vst.msk [vmem:[%s3228_s29 + $0x48] sm:$0xff] %vm1604_vm0, %v1597_v44  ;;  %v1433_v18 = vpop.xlane.xlu0 %1432  ;;  %v2415_v19 = vpop.eup %2414 }
 0x269   : > { %v1598_v36 = vmul.f32 %v2409_v8, %v1433_v18  ;;  %v1435_v39 = vpop.xlane.xlu1 %1434 }
 0x26a   : > { %v1599_v40 = vmul.f32 %v2411_v35, %v1435_v39 }
 0x26b   : > { %1615 = vst.msk [vmem:[%s3228_s29 + $0x50] sm:$0xff] %vm1604_vm0, %v1598_v36 }
 0x26c   : > { %1616 = vst.msk [vmem:[%s3228_s29 + $0x58] sm:$0xff] %vm1604_vm0, %v1599_v40  ;;  %v1437_v21 = vpop.xlane.xlu0 %1436 }
 0x26d   : > { %v1600_v41 = vmul.f32 %v2413_v9, %v1437_v21  ;;  %v1439_v2 = vpop.xlane.xlu1 %1438 }
 0x26e   : > { %v1601_v42 = vmul.f32 %v2415_v19, %v1439_v2 }
 0x26f   : > { %v2417_v34 = vpop.eup %2416  ;;  %1617 = vst.msk [vmem:[%s3228_s29 + $0x60] sm:$0xff] %vm1604_vm0, %v1600_v41 }
 0x270   : > { %1618 = vst.msk [vmem:[%s3228_s29 + $0x68] sm:$0xff] %vm1604_vm0, %v1601_v42  ;;  %v1441_v31 = vpop.xlane.xlu0 %1440  ;;  %v2419_v45 = vpop.eup %2418  ;;  %1627 = sbr.rel (!%p3379_p1) target bundleno = 670 (0x29e), region = 52 }
 0x271   : > { %v1602_v46 = vmul.f32 %v2417_v34, %v1441_v31  ;;  %v1443_v48 = vpop.xlane.xlu1 %1442 }
 0x272   : > { %v1603_v26 = vmul.f32 %v2419_v45, %v1443_v48 }
 0x273   : > { %1619 = vst.msk [vmem:[%s3228_s29 + $0x70] sm:$0xff] %vm1604_vm0, %v1602_v46 }
 0x274   : > { %1620 = vst.msk [vmem:[%s3228_s29 + $0x78] sm:$0xff] %vm1604_vm0, %v1603_v26 }
 0x275   : > { %s3392_s7 = smov (!%p1630_p6, %s1629_s7), 16 }
 0x276   : > { %s1970_s12 = sshll.u32 %s3392_s7, 7 }
 0x277   : > { %p1973_p7 = scmp.eq.s32.totalorder %s1970_s12, 0 }
 0x278   : > { %s3275_s26 = sshrl.u32 (!%p1973_p7), %s3392_s7, 4 }
 0x279   : > { %1638 = sbr.rel (%p1973_p7) target bundleno = 670 (0x29e), region = 56  ;;  %p1974_p9 = scmp.le.s32.totalorder (!%p1973_p7), %s3275_s26, 0 }
 0x27e   : > { %1875 = sbr.rel (%p1974_p9) target bundleno = 653 (0x28d), region = 147  ;;  %s3380_s19 = smov (!%p1974_p9), %s3269_s10 }
 0x27f   : > { %s3381_s13 = smov (!%p1974_p9), %s3228_s29  ;;  %s3284_s24 = smov (!%p1974_p9), 0  }
 0x280   : > { %s3286_s15 = smov (!%p1974_p9), 0  }
 0x283 LB: >> { %v1731_v47 = vld [vmem:[%s2580_s13] sm:$0xff]  ;;  %v1733_v14 = vld [vmem:[%s2580_s13 + $0x8] sm:$0xff]  ;;  %v1735_v49 = vld [vmem:[%s2580_s13 + $0x10] sm:$0xff]  ;;  %s1763_s30 = sadd.s32 1, %s2584_s24  ;;  %s1725_s15 = sadd.s32 1, %s2588_s15   ;;  %s2588_s15 = sphi %s3286_s15, %s1725_s15   ;;  %s2584_s24 = sphi %s3284_s24, %s3382_s24   ;;  %s2580_s13 = sphi %s3381_s13, %s1768_s13   ;;  %s2576_s19 = sphi %s3380_s19, %s1769_s19  }
 0x284   : >> { %1732 = vst [vmem:[%s2576_s19] sm:$0xff] %v1731_v47  ;;  %1734 = vst [vmem:[%s2576_s19 + $0x8] sm:$0xff] %v1733_v14  ;;  %v1737_v43 = vld [vmem:[%s2580_s13 + $0x18] sm:$0xff]  ;;  %v1739_v51 = vld [vmem:[%s2580_s13 + $0x20] sm:$0xff]  ;;  %p1764_p8 = scmp.ge.s32.totalorder %s1763_s30, %s3275_s26  ;;  %p1724_p12 = scmp.ge.s32.totalorder %s1725_s15, %s3275_s26 }
 0x285   : >> { %1736 = vst [vmem:[%s2576_s19 + $0x10] sm:$0xff] %v1735_v49  ;;  %v1741_v52 = vld [vmem:[%s2580_s13 + $0x28] sm:$0xff]  ;;  %1738 = vst [vmem:[%s2576_s19 + $0x18] sm:$0xff] %v1737_v43  ;;  %v1743_v55 = vld [vmem:[%s2580_s13 + $0x30] sm:$0xff] }
 0x286   : >> { %1740 = vst [vmem:[%s2576_s19 + $0x20] sm:$0xff] %v1739_v51  ;;  %1742 = vst [vmem:[%s2576_s19 + $0x28] sm:$0xff] %v1741_v52  ;;  %v1745_v29 = vld [vmem:[%s2580_s13 + $0x38] sm:$0xff]  ;;  %v1747_v57 = vld [vmem:[%s2580_s13 + $0x40] sm:$0xff]  ;;  %s3394_s30 = smov (%p1764_p8, %s1763_s30), 0 }
 0x287   : >> { %1744 = vst [vmem:[%s2576_s19 + $0x30] sm:$0xff] %v1743_v55  ;;  %1746 = vst [vmem:[%s2576_s19 + $0x38] sm:$0xff] %v1745_v29  ;;  %v1749_v58 = vld [vmem:[%s2580_s13 + $0x48] sm:$0xff]  ;;  %v1751_v15 = vld [vmem:[%s2580_s13 + $0x50] sm:$0xff]  ;;  %s1975_s22 = sshll.u32 %s3394_s30, 7  ;;  %s3382_s24 = smov %s3394_s30 }
 0x288   : >> { %1748 = vst [vmem:[%s2576_s19 + $0x40] sm:$0xff] %v1747_v57  ;;  %v1753_v12 = vld [vmem:[%s2580_s13 + $0x58] sm:$0xff]  ;;  %1750 = vst [vmem:[%s2576_s19 + $0x48] sm:$0xff] %v1749_v58  ;;  %v1755_v27 = vld [vmem:[%s2580_s13 + $0x60] sm:$0xff]  ;;  %1727 = sbr.rel (!%p1724_p12) target bundleno = 643 (0x283), region = 153 }
 0x289   : >> { %1752 = vst [vmem:[%s2576_s19 + $0x50] sm:$0xff] %v1751_v15  ;;  %1754 = vst [vmem:[%s2576_s19 + $0x58] sm:$0xff] %v1753_v12  ;;  %v1757_v56 = vld [vmem:[%s2580_s13 + $0x68] sm:$0xff]  ;;  %v1759_v24 = vld [vmem:[%s2580_s13 + $0x70] sm:$0xff] }
 0x28a   : >> { %1756 = vst [vmem:[%s2576_s19 + $0x60] sm:$0xff] %v1755_v27  ;;  %1758 = vst [vmem:[%s2576_s19 + $0x68] sm:$0xff] %v1757_v56  ;;  %v1761_v53 = vld [vmem:[%s2580_s13 + $0x78] sm:$0xff]  ;;  %s1768_s13 = scalar_lea.vmem %s3228_s29, %s1975_s22 [#allocation7]  }
 0x28b   : >> { %1760 = vst [vmem:[%s2576_s19 + $0x70] sm:$0xff] %v1759_v24  ;;  %1762 = vst [vmem:[%s2576_s19 + $0x78] sm:$0xff] %v1761_v53  ;;  %s1769_s19 = scalar_lea.vmem %s3269_s10, %s1975_s22  }
 0x28d PF: > { %s3344_s28 = sand.u32 15, %s3392_s7   ;;  %s1992_s11 = sshll.u32 %s3275_s26, 7 }
 0x28e   : > { %s1774_s27 = scalar_lea.vmem %s3228_s29, %s1992_s11 [#allocation7]   ;;  %s1776_s14 = scalar_lea.vmem %s3269_s10, %s1992_s11  }
 0x28f   : > { %p1980_p13 = scmp.le.s32.totalorder %s3344_s28, 0 }
 0x290   : > { %s2590_s25 = smov (!%p1980_p13), %s1776_s14   ;;  %s2594_s5 = smov (!%p1980_p13), %s1774_s27  }
 0x291   : > { %1889 = sbr.rel (%p1980_p13) target bundleno = 670 (0x29e), region = 158  ;;  %s2598_s21 = smov (!%p1980_p13), 0  }
 0x292   : > { %s2602_s18 = smov (!%p1980_p13), 0  }
 0x296 LB: >> { %v1786_v59 = vld [vmem:[%s2596_s5] sm:$0xff]  ;;  %s1788_s6 = sadd.s32 1, %s2600_s21  ;;  %s1780_s18 = sadd.s32 1, %s2604_s18   ;;  %s2604_s18 = sphi %s2602_s18, %s1780_s18   ;;  %s2600_s21 = sphi %s2598_s21, %s2599_s21   ;;  %s2596_s5 = sphi %s2594_s5, %s1793_s5   ;;  %s2592_s25 = sphi %s2590_s25, %s1794_s25  }
 0x297   : >> { %1787 = vst [vmem:[%s2592_s25] sm:$0xff] %v1786_v59  ;;  %p1789_p2 = scmp.ge.s32.totalorder %s1788_s6, %s3344_s28  ;;  %p1779_p5 = scmp.ge.s32.totalorder %s1780_s18, %s3344_s28 }
 0x299   : >> { %s3396_s6 = smov (%p1789_p2, %s1788_s6), 0  ;;  %1782 = sbr.rel (!%p1779_p5) target bundleno = 662 (0x296), region = 164 }
 0x29a   : >> { %s1981_s29 = sshll.u32 %s3396_s6, 3  ;;  %s2599_s21 = smov %s3396_s6  }
 0x29b   : >> { %s1793_s5 = scalar_lea.vmem %s1774_s27, %s1981_s29 [#allocation7]   ;;  %s1794_s25 = scalar_lea.vmem %s1776_s14, %s1981_s29  }
 0x29e PF: > { %p17_p10 = scmp.ge.s32.totalorder %s2662_s20, 5   ;;  %s3383_s15 = smov %s2564_s16 }
 0x29f   : > { %s3384_s16 = smov %s2568_s17  ;;  %s3385_s17 = smov %s2672_s23 }
 0x2a0   : > { %s3386_s18 = smov %s2662_s20  ;;  %19 = sbr.rel (!%p17_p10) target bundleno = 5 (0x5), region = 175 }
 0x2a5   :  { %1810 = vsyncpa [#allocation3], 1 }
 0x2a6   :  { %1812 = vsyncpa [#allocation3 + $0x1], 1 }
 0x2a7   :  { %1813 = vsyncpa [#allocation5], 1 }
 0x2a8   :  { %1815 = vsyncpa [#allocation5 + $0x1], 1 }

</bundles_post_ra>
